<compile_context>
chip_gen: v5e
topology: v5e:2x2
jax: 0.10.0
libtpu: 0.0.40
codegen_flags: <defaults>
</compile_context>

<pallas_src>
import functools

import jax
import jax.numpy as jnp
from jax.experimental import pallas as pl
from jax.experimental.pallas import tpu as pltpu


def _vmem_limit_bytes():
    # v7x has only 64 MiB VMEM per TensorCore; stay well below it everywhere.
    cap = 64 * 1024 * 1024
    try:
        cap = int(getattr(pltpu.get_tpu_info(), "vmem_capacity_bytes", cap))
    except Exception:
        pass
    return int(min(cap * 3 // 4, 48 * 1024 * 1024))


_VMEM_LIMIT = _vmem_limit_bytes()


# ----------------------------------------------------------------------------
# Fused GCN-stack kernel: one batch element per grid step, all layers in VMEM.
# ----------------------------------------------------------------------------
def _gcn_stack_kernel(x_ref, adj_ref, w_ref, b_ref, o_ref, *,
                      n_layers, skip_connection, n_skip, compute_dtype):
    h = x_ref[...].astype(jnp.float32)            # (N, D) activation, f32
    adj = adj_ref[...].astype(compute_dtype)      # (N, N) dense adjacency
    identity = []                                 # skip-connection stack
    for l in range(n_layers):                     # unrolled at trace time
        if skip_connection:
            if len(identity) >= n_skip:
                identity.pop(0)
            identity.append(h)                    # == x.clone() before layer
        w = w_ref[l]                              # (D, D), already compute_dtype
        # GraphConvolution: support = x @ W ; out = adj @ support + b
        # (torch.spmm with a dense adjacency == dense MXU matmul).
        support = jnp.dot(h.astype(compute_dtype), w,
                          preferred_element_type=jnp.float32)
        y = jnp.dot(adj, support.astype(compute_dtype),
                    preferred_element_type=jnp.float32)
        y = y + b_ref[l].astype(jnp.float32)      # (1, D) bias broadcast
        h = jnp.maximum(y, 0.0)                   # F.relu on every layer
        # TODO(synk): F.dropout is identity in inference mode; training-mode
        # (RNG-masked) dropout is not implemented.
        for ident in identity:
            h = h + ident                         # x += id_
    o_ref[...] = h.astype(o_ref.dtype)


def gcn_forward(x, adj, weights, biases, *, skip_connection=False, n_skip=2,
                compute_dtype=jnp.bfloat16):
    """GCN.forward (inference).

    x:       (B, N, D) or (N, D)  node features
    adj:     (B, N, N) or (N, N)  dense adjacency
    weights: (L, D, D)            GraphConvolution weights (L = n_layers)
    biases:  (L, D)               GraphConvolution biases
    """
    squeeze = x.ndim == 2
    if squeeze:
        x = x[None]
        adj = adj[None]
    B, N, D = x.shape
    L = int(weights.shape[0])

    x_f32 = x.astype(jnp.float32)                       # keep skips in f32
    adj_c = adj.astype(compute_dtype)                   # matmul-only operand
    w_c = weights.astype(compute_dtype)                 # bf16 halves DMA/VMEM
    b_f32 = biases.reshape(L, 1, D).astype(jnp.float32)

    out = pl.pallas_call(
        functools.partial(_gcn_stack_kernel, n_layers=L,
                          skip_connection=skip_connection, n_skip=n_skip,
                          compute_dtype=compute_dtype),
        out_shape=jax.ShapeDtypeStruct((B, N, D), jnp.float32),
        grid=(B,),
        in_specs=[
            pl.BlockSpec((None, N, D), lambda b: (b, 0, 0)),   # x   (per batch)
            pl.BlockSpec((None, N, N), lambda b: (b, 0, 0)),   # adj (per batch)
            pl.BlockSpec((L, D, D), lambda b: (0, 0, 0)),      # weight stack
            pl.BlockSpec((L, 1, D), lambda b: (0, 0, 0)),      # bias stack
        ],
        out_specs=pl.BlockSpec((None, N, D), lambda b: (b, 0, 0)),
        compiler_params=pltpu.CompilerParams(
            dimension_semantics=("parallel",),   # batch -> both TCs on v7x
            vmem_limit_bytes=_VMEM_LIMIT),
    )(x_f32, adj_c, w_c, b_f32)

    return out[0] if squeeze else out


# ----------------------------------------------------------------------------
# Pure-JAX reference (same bf16-in / f32-accumulate casting) for validation.
# ----------------------------------------------------------------------------
def gcn_reference(x, adj, weights, biases, *, skip_connection=False, n_skip=2,
                  compute_dtype=jnp.bfloat16):
    h = x.astype(jnp.float32)
    adj_c = adj.astype(compute_dtype)
    identity = []
    for l in range(weights.shape[0]):
        if skip_connection:
            if len(identity) >= n_skip:
                identity.pop(0)
            identity.append(h)
        support = jnp.einsum("bnd,de->bne",
                             h.astype(compute_dtype),
                             weights[l].astype(compute_dtype),
                             preferred_element_type=jnp.float32)
        y = jnp.einsum("bnm,bme->bne", adj_c, support.astype(compute_dtype),
                       preferred_element_type=jnp.float32)
        h = jnp.maximum(y + biases[l][None, None, :], 0.0)
        for ident in identity:
            h = h + ident
    return h


if __name__ == "__main__":
    B, N, D, L = 2, 128, 256, 3
    key = jax.random.PRNGKey(0)
    kx, ka, kw, kb = jax.random.split(key, 4)

    x = 0.5 * jax.random.normal(kx, (B, N, D), dtype=jnp.float32)
    a = jax.random.uniform(ka, (B, N, N), dtype=jnp.float32)
    adj = 0.5 * (a + jnp.swapaxes(a, 1, 2))
    adj = adj / jnp.sum(adj, axis=-1, keepdims=True)      # row-normalized dense adj
    weights = jax.random.normal(kw, (L, D, D), dtype=jnp.float32) / jnp.sqrt(D)
    biases = 0.01 * jax.random.normal(kb, (L, D), dtype=jnp.float32)

    fwd = jax.jit(functools.partial(gcn_forward, skip_connection=False))
    fwd_skip = jax.jit(functools.partial(gcn_forward,
                                         skip_connection=True, n_skip=2))

    out = jax.block_until_ready(fwd(x, adj, weights, biases))
    out_skip = jax.block_until_ready(fwd_skip(x, adj, weights, biases))

    ref = gcn_reference(x, adj, weights, biases, skip_connection=False)
    ref_skip = gcn_reference(x, adj, weights, biases,
                             skip_connection=True, n_skip=2)

    err = float(jnp.max(jnp.abs(out - ref)))
    err_skip = float(jnp.max(jnp.abs(out_skip - ref_skip)))
    assert err < 5e-2 and err_skip < 5e-2, (err, err_skip)
    print("KERNEL_OK")
</pallas_src>

<mosaic_0001>
module attributes {stable_mosaic.version = 11 : i64} {
  func.func @_gcn_stack_kernel(%arg0: i32, %arg1: memref<1x128x256xf32, #tpu.memory_space<vmem>>, %arg2: memref<1x128x128xbf16, #tpu.memory_space<vmem>>, %arg3: memref<3x256x256xbf16, #tpu.memory_space<vmem>>, %arg4: memref<3x1x256xf32, #tpu.memory_space<vmem>>, %arg5: memref<1x128x256xf32, #tpu.memory_space<vmem>>) attributes {dimension_semantics = [#tpu.dimension_semantics<parallel>], iteration_bounds = array<i64: 2>, scalar_prefetch = 0 : i64, scratch_operands = 0 : i64, tpu.core_type = #tpu.core_type<tc>, window_params = [{transform_indices = @transform_0, window_bounds = array<i64: 1, 128, 256>}, {transform_indices = @transform_1, window_bounds = array<i64: 1, 128, 128>}, {pipeline_mode = #tpu.pipeline_mode<synchronous>, transform_indices = @transform_2, window_bounds = array<i64: 3, 256, 256>}, {pipeline_mode = #tpu.pipeline_mode<synchronous>, transform_indices = @transform_3, window_bounds = array<i64: 3, 1, 256>}, {transform_indices = @transform_4, window_bounds = array<i64: 1, 128, 256>}]} {
    %c0 = arith.constant 0 : index
    %c0_0 = arith.constant 0 : index
    %c0_1 = arith.constant 0 : index
    %0 = vector.load %arg1[%c0, %c0_0, %c0_1] : memref<1x128x256xf32, #tpu.memory_space<vmem>>, vector<1x128x256xf32>
    %1 = vector.shape_cast %0 : vector<1x128x256xf32> to vector<128x256xf32>
    %c0_2 = arith.constant 0 : index
    %c0_3 = arith.constant 0 : index
    %c0_4 = arith.constant 0 : index
    %2 = vector.load %arg2[%c0_2, %c0_3, %c0_4] : memref<1x128x128xbf16, #tpu.memory_space<vmem>>, vector<1x128x128xbf16>
    %3 = vector.shape_cast %2 : vector<1x128x128xbf16> to vector<128x128xbf16>
    %c0_5 = arith.constant 0 : index
    %c0_6 = arith.constant 0 : index
    %c0_7 = arith.constant 0 : index
    %4 = vector.load %arg3[%c0_5, %c0_6, %c0_7] : memref<3x256x256xbf16, #tpu.memory_space<vmem>>, vector<1x256x256xbf16>
    %5 = vector.shape_cast %4 : vector<1x256x256xbf16> to vector<256x256xbf16>
    %6 = arith.truncf %1 : vector<128x256xf32> to vector<128x256xbf16>
    %cst = arith.constant dense<0.000000e+00> : vector<128x256xf32>
    %7 = tpu.matmul %6, %5, %cst {dimension_numbers = #tpu.dot_dimension_numbers<[1], [0], [0], [1], [0, 0, 1, 1], [], []>} : vector<128x256xbf16>, vector<256x256xbf16>, vector<128x256xf32> -> vector<128x256xf32>
    %8 = arith.truncf %7 : vector<128x256xf32> to vector<128x256xbf16>
    %cst_8 = arith.constant dense<0.000000e+00> : vector<128x256xf32>
    %9 = tpu.matmul %3, %8, %cst_8 {dimension_numbers = #tpu.dot_dimension_numbers<[1], [0], [0], [1], [0, 0, 1, 1], [], []>} : vector<128x128xbf16>, vector<128x256xbf16>, vector<128x256xf32> -> vector<128x256xf32>
    %c0_9 = arith.constant 0 : index
    %c0_10 = arith.constant 0 : index
    %c0_11 = arith.constant 0 : index
    %10 = vector.load %arg4[%c0_9, %c0_10, %c0_11] : memref<3x1x256xf32, #tpu.memory_space<vmem>>, vector<1x1x256xf32>
    %11 = vector.shape_cast %10 : vector<1x1x256xf32> to vector<1x256xf32>
    %12 = vector.broadcast %11 : vector<1x256xf32> to vector<128x256xf32>
    %13 = arith.addf %9, %12 : vector<128x256xf32>
    %cst_12 = arith.constant 0.000000e+00 : f32
    %14 = vector.broadcast %cst_12 : f32 to vector<128x256xf32>
    %15 = arith.maximumf %13, %14 : vector<128x256xf32>
    %c1 = arith.constant 1 : index
    %c0_13 = arith.constant 0 : index
    %c0_14 = arith.constant 0 : index
    %16 = vector.load %arg3[%c1, %c0_13, %c0_14] : memref<3x256x256xbf16, #tpu.memory_space<vmem>>, vector<1x256x256xbf16>
    %17 = vector.shape_cast %16 : vector<1x256x256xbf16> to vector<256x256xbf16>
    %18 = arith.truncf %15 : vector<128x256xf32> to vector<128x256xbf16>
    %cst_15 = arith.constant dense<0.000000e+00> : vector<128x256xf32>
    %19 = tpu.matmul %18, %17, %cst_15 {dimension_numbers = #tpu.dot_dimension_numbers<[1], [0], [0], [1], [0, 0, 1, 1], [], []>} : vector<128x256xbf16>, vector<256x256xbf16>, vector<128x256xf32> -> vector<128x256xf32>
    %20 = arith.truncf %19 : vector<128x256xf32> to vector<128x256xbf16>
    %cst_16 = arith.constant dense<0.000000e+00> : vector<128x256xf32>
    %21 = tpu.matmul %3, %20, %cst_16 {dimension_numbers = #tpu.dot_dimension_numbers<[1], [0], [0], [1], [0, 0, 1, 1], [], []>} : vector<128x128xbf16>, vector<128x256xbf16>, vector<128x256xf32> -> vector<128x256xf32>
    %c1_17 = arith.constant 1 : index
    %c0_18 = arith.constant 0 : index
    %c0_19 = arith.constant 0 : index
    %22 = vector.load %arg4[%c1_17, %c0_18, %c0_19] : memref<3x1x256xf32, #tpu.memory_space<vmem>>, vector<1x1x256xf32>
    %23 = vector.shape_cast %22 : vector<1x1x256xf32> to vector<1x256xf32>
    %24 = vector.broadcast %23 : vector<1x256xf32> to vector<128x256xf32>
    %25 = arith.addf %21, %24 : vector<128x256xf32>
    %cst_20 = arith.constant 0.000000e+00 : f32
    %26 = vector.broadcast %cst_20 : f32 to vector<128x256xf32>
    %27 = arith.maximumf %25, %26 : vector<128x256xf32>
    %c2 = arith.constant 2 : index
    %c0_21 = arith.constant 0 : index
    %c0_22 = arith.constant 0 : index
    %28 = vector.load %arg3[%c2, %c0_21, %c0_22] : memref<3x256x256xbf16, #tpu.memory_space<vmem>>, vector<1x256x256xbf16>
    %29 = vector.shape_cast %28 : vector<1x256x256xbf16> to vector<256x256xbf16>
    %30 = arith.truncf %27 : vector<128x256xf32> to vector<128x256xbf16>
    %cst_23 = arith.constant dense<0.000000e+00> : vector<128x256xf32>
    %31 = tpu.matmul %30, %29, %cst_23 {dimension_numbers = #tpu.dot_dimension_numbers<[1], [0], [0], [1], [0, 0, 1, 1], [], []>} : vector<128x256xbf16>, vector<256x256xbf16>, vector<128x256xf32> -> vector<128x256xf32>
    %32 = arith.truncf %31 : vector<128x256xf32> to vector<128x256xbf16>
    %cst_24 = arith.constant dense<0.000000e+00> : vector<128x256xf32>
    %33 = tpu.matmul %3, %32, %cst_24 {dimension_numbers = #tpu.dot_dimension_numbers<[1], [0], [0], [1], [0, 0, 1, 1], [], []>} : vector<128x128xbf16>, vector<128x256xbf16>, vector<128x256xf32> -> vector<128x256xf32>
    %c2_25 = arith.constant 2 : index
    %c0_26 = arith.constant 0 : index
    %c0_27 = arith.constant 0 : index
    %34 = vector.load %arg4[%c2_25, %c0_26, %c0_27] : memref<3x1x256xf32, #tpu.memory_space<vmem>>, vector<1x1x256xf32>
    %35 = vector.shape_cast %34 : vector<1x1x256xf32> to vector<1x256xf32>
    %36 = vector.broadcast %35 : vector<1x256xf32> to vector<128x256xf32>
    %37 = arith.addf %33, %36 : vector<128x256xf32>
    %cst_28 = arith.constant 0.000000e+00 : f32
    %38 = vector.broadcast %cst_28 : f32 to vector<128x256xf32>
    %39 = arith.maximumf %37, %38 : vector<128x256xf32>
    %c0_29 = arith.constant 0 : index
    %c0_30 = arith.constant 0 : index
    %c0_31 = arith.constant 0 : index
    %40 = vector.load %arg5[%c0_29, %c0_30, %c0_31] : memref<1x128x256xf32, #tpu.memory_space<vmem>>, vector<1x128x256xf32>
    %41 = vector.shape_cast %40 : vector<1x128x256xf32> to vector<128x256xf32>
    %42 = vector.shape_cast %39 : vector<128x256xf32> to vector<1x128x256xf32>
    tpu.vector_store %arg5[%c0_29, %c0_30, %c0_31], %42 {strides = array<i32>} : memref<1x128x256xf32, #tpu.memory_space<vmem>>, vector<1x128x256xf32>,
    return
  }
  func.func @transform_0(%arg0: i32) -> (i32, i32, i32) {
    %c0_i32 = arith.constant 0 : i32
    %c0_i32_0 = arith.constant 0 : i32
    %c0_i32_1 = arith.constant 0 : i32
    return %arg0, %c0_i32, %c0_i32_0 : i32, i32, i32
  }
  func.func @transform_1(%arg0: i32) -> (i32, i32, i32) {
    %c0_i32 = arith.constant 0 : i32
    %c0_i32_0 = arith.constant 0 : i32
    %c0_i32_1 = arith.constant 0 : i32
    return %arg0, %c0_i32, %c0_i32_0 : i32, i32, i32
  }
  func.func @transform_2(%arg0: i32) -> (i32, i32, i32) {
    %c0_i32 = arith.constant 0 : i32
    %c0_i32_0 = arith.constant 0 : i32
    %c0_i32_1 = arith.constant 0 : i32
    %c0_i32_2 = arith.constant 0 : i32
    return %c0_i32, %c0_i32_0, %c0_i32_1 : i32, i32, i32
  }
  func.func @transform_3(%arg0: i32) -> (i32, i32, i32) {
    %c0_i32 = arith.constant 0 : i32
    %c0_i32_0 = arith.constant 0 : i32
    %c0_i32_1 = arith.constant 0 : i32
    %c0_i32_2 = arith.constant 0 : i32
    return %c0_i32, %c0_i32_0, %c0_i32_1 : i32, i32, i32
  }
  func.func @transform_4(%arg0: i32) -> (i32, i32, i32) {
    %c0_i32 = arith.constant 0 : i32
    %c0_i32_0 = arith.constant 0 : i32
    %c0_i32_1 = arith.constant 0 : i32
    return %arg0, %c0_i32, %c0_i32_0 : i32, i32, i32
  }
}

</mosaic_0001>

<bundles_post_ra>
// kernel: gcn_forward.1
= control target key start
LH: loop header
LB: loop body
LE: loop exit
PB: predicated region body
PF: predicated region fallthrough
CT: control target
= control target key end

     0   :  { %9 = vsyncpa [#allocation3], 0  ;;  %s3978_s0 = inlined_call_operand.vmem [shape: f32[2,128,256], index: 0, kind: input, shape index: {}]   ;;  %s3979_s1 = inlined_call_operand.vmem [shape: bf16[2,128,128], index: 1, kind: input, shape index: {}]   ;;  %s3980_s2 = inlined_call_operand.vmem [shape: bf16[3,256,256], index: 2, kind: input, shape index: {}]   ;;  %s3981_s3 = inlined_call_operand.vmem [shape: f32[3,1,256], index: 3, kind: input, shape index: {}]   ;;  %s3982_s4 = inlined_call_operand.hbm [shape: f32[2,128,256], index: 4, kind: output, shape index: {}]  }
   0x1   :  { %11 = vsyncpa [#allocation3 + $0x1], 0  ;;  %s2865_s15 = smov 0   ;;  %s2867_s16 = smov 0  }
   0x2   :  { %s2869_s17 = smov 0   ;;  %s2871_s18 = smov 0  }
   0x3 LB: > { %s2886_s19 = sadd.s32 4294967295, %s2836_s18   ;;  %s2106_s20 = sadd.s32 4294967294, %s2836_s18   ;;  %s2836_s18 = sphi %s2871_s18, %s4037_s18   ;;  %s2832_s17 = sphi %s2869_s17, %s4036_s17   ;;  %s2828_s16 = sphi %s2867_s16, %s4035_s16   ;;  %s2824_s15 = sphi %s2865_s15, %s4034_s15  }
   0x4   : > { %s2890_s21 = sadd.s32 1, %s2836_s18   ;;  %s118_s22 = sadd.s32 1, %s2832_s17 }
   0x5   : > { %s115_s23 = ssub.s32 %s2836_s18, %s2890_s21  ;;  %p128_p0 = scmp.ne.s32.totalorder %s2832_s17, %s2828_s16 }
   0x6   : > { %p116_p1 = scmp.eq.s32.totalorder %s115_s23, 0  ;;  %p129_p2 = scmp.eq.s32.totalorder %s2886_s19, 1 }
   0x7   : > { %p134_p3 = scmp.ne.s32.totalorder %s2828_s16, %s2824_s15  ;;  %p135_p4 = scmp.eq.s32.totalorder %s2106_s20, 1 }
   0x8   : > { %s2901_s24 = scalar_select %p116_p1, %s2832_s17, %s118_s22  }
   0x9   : > { %p2903_p5 = por %p129_p2, %p128_p0  ;;  %p2907_p6 = por %p135_p4, %p134_p3 }
   0xa   : > { %p2109_p7 = scmp.ge.s32.totalorder %s2836_s18, 1  ;;  %p175_p8 = scmp.lt.s32.totalorder %s2836_s18, 3 }
   0xc   : > { %p176_p9 = pnand %p2109_p7, %p175_p8 }
   0xe   : > { %179 = sbr.rel (%p176_p9) target bundleno = 1519 (0x5ef), region = 36 }
  0x13   : > { %v2173_v0 = vld [vmem:[%s3980_s2 + $0x70] sm:$0xf]  ;;  %v2627_v1 = vld [vmem:[%s3980_s2 + $0x74] sm:$0xf0]  ;;  %v2165_v5 = vld [vmem:[%s3980_s2 + $0x60] sm:$0xf] }
  0x14   : > { %v2237_v2 = vld [vmem:[%s3980_s2 + $0xf0] sm:$0xf]  ;;  %v2174_v3 = vor.u32 %v2627_v1, %v2173_v0  ;;  %v2643_v4 = vld [vmem:[%s3980_s2 + $0xf4] sm:$0xf0]  ;;  %v2625_v6 = vld [vmem:[%s3980_s2 + $0x64] sm:$0xf0] }
  0x15   : > { %v2238_v7 = vor.u32 %v2643_v4, %v2237_v2  ;;  %v2229_v8 = vld [vmem:[%s3980_s2 + $0xe0] sm:$0xf]  ;;  %v2641_v9 = vld [vmem:[%s3980_s2 + $0xe4] sm:$0xf0]  ;;  %v2166_v10 = vor.u32 %v2625_v6, %v2165_v5  ;;  %v2157_v12 = vld [vmem:[%s3980_s2 + $0x50] sm:$0xf] }
  0x16   : > { %2709 = vmatpush.bf16.msra.mxu2 %v2174_v3  ;;  %472 = vmatpush.bf16.msra.mxu0 %v2174_v3  ;;  %v2230_v11 = vor.u32 %v2641_v9, %v2229_v8  ;;  %v2623_v13 = vld [vmem:[%s3980_s2 + $0x54] sm:$0xf0]  ;;  %v2221_v14 = vld [vmem:[%s3980_s2 + $0xd0] sm:$0xf]  ;;  %v2149_v18 = vld [vmem:[%s3980_s2 + $0x40] sm:$0xf] }
  0x17   : > { %2717 = vmatpush.bf16.msra.mxu3 %v2238_v7  ;;  %521 = vmatpush.bf16.msra.mxu1 %v2238_v7  ;;  %v2639_v15 = vld [vmem:[%s3980_s2 + $0xd4] sm:$0xf0]  ;;  %v2158_v16 = vor.u32 %v2623_v13, %v2157_v12  ;;  %v2621_v19 = vld [vmem:[%s3980_s2 + $0x44] sm:$0xf0]  ;;  %v2213_v20 = vld [vmem:[%s3980_s2 + $0xc0] sm:$0xf] }
  0x18   : > { %v2222_v17 = vor.u32 %v2639_v15, %v2221_v14  ;;  %v2637_v21 = vld [vmem:[%s3980_s2 + $0xc4] sm:$0xf0]  ;;  %v2150_v22 = vor.u32 %v2621_v19, %v2149_v18  ;;  %v2141_v24 = vld [vmem:[%s3980_s2 + $0x30] sm:$0xf]  ;;  %v2619_v25 = vld [vmem:[%s3980_s2 + $0x34] sm:$0xf0] }
  0x19   : > { %v2214_v23 = vor.u32 %v2637_v21, %v2213_v20  ;;  %v2205_v26 = vld [vmem:[%s3980_s2 + $0xb0] sm:$0xf]  ;;  %v2635_v27 = vld [vmem:[%s3980_s2 + $0xb4] sm:$0xf0]  ;;  %p206_p10 = scmp.lt.s32.totalorder %s2886_s19, 1  ;;  %v2142_v28 = vor.u32 %v2619_v25, %v2141_v24  ;;  %s203_s23 = sand.u32 1, %s2828_s16  }
  0x1a   : > { %2710 = vmatpush.bf16.msra.mxu2 %v2166_v10  ;;  %473 = vmatpush.bf16.msra.mxu0 %v2166_v10  ;;  %v2206_v29 = vor.u32 %v2635_v27, %v2205_v26  ;;  %v2133_v30 = vld [vmem:[%s3980_s2 + $0x20] sm:$0xf]  ;;  %v2617_v31 = vld [vmem:[%s3980_s2 + $0x24] sm:$0xf0]  ;;  %v2125_v36 = vld [vmem:[%s3980_s2 + $0x10] sm:$0xf] }
  0x1b   : > { %2718 = vmatpush.bf16.msra.mxu3 %v2230_v11  ;;  %522 = vmatpush.bf16.msra.mxu1 %v2230_v11  ;;  %v2197_v32 = vld [vmem:[%s3980_s2 + $0xa0] sm:$0xf]  ;;  %v2633_v33 = vld [vmem:[%s3980_s2 + $0xa4] sm:$0xf0]  ;;  %s2987_s20 = scalar_select %p206_p10, %s2886_s19, 1  ;;  %v2134_v34 = vor.u32 %v2617_v31, %v2133_v30 }
  0x1c   : > { %v2198_v35 = vor.u32 %v2633_v33, %v2197_v32  ;;  %v2615_v37 = vld [vmem:[%s3980_s2 + $0x14] sm:$0xf0]  ;;  %v2189_v38 = vld [vmem:[%s3980_s2 + $0x90] sm:$0xf]  ;;  %v2117_v42 = vld [vmem:[%s3980_s2] sm:$0xf] }
  0x1d   : > { %v2631_v39 = vld [vmem:[%s3980_s2 + $0x94] sm:$0xf0]  ;;  %s2602_s7 = sshll.u32 %s2987_s20, 8  ;;  %v2126_v40 = vor.u32 %v2615_v37, %v2125_v36  ;;  %v2613_v43 = vld [vmem:[%s3980_s2 + $0x4] sm:$0xf0]  ;;  %s2110_s27 = sshll.u32 %s203_s23, 8 }
  0x1e   : > { %2711 = vmatpush.bf16.msra.mxu2 %v2158_v16  ;;  %474 = vmatpush.bf16.msra.mxu0 %v2158_v16  ;;  %v2190_v41 = vor.u32 %v2631_v39, %v2189_v38  ;;  %s3011_s14 = scalar_lea.vmem %s3978_s0, %s2602_s7  ;;  %v2181_v44 = vld [vmem:[%s3980_s2 + $0x80] sm:$0xf]  ;;  %v2629_v45 = vld [vmem:[%s3980_s2 + $0x84] sm:$0xf0]  ;;  %v2118_v46 = vor.u32 %v2613_v43, %v2117_v42  ;;  %v2626_v54 = vld [vmem:[%s3980_s2 + $0x74] sm:$0xf] }
  0x1f   : > { %2719 = vmatpush.bf16.msra.mxu3 %v2222_v17  ;;  %523 = vmatpush.bf16.msra.mxu1 %v2222_v17  ;;  %v232_v47 = vld [vmem:[%s3011_s14 + $0x80] sm:$0xff]  ;;  %v234_v48 = vld [vmem:[%s3011_s14 + $0x90] sm:$0xff]  ;;  %v2182_v49 = vor.u32 %v2629_v45, %v2181_v44  ;;  %v233_v50 = vld [vmem:[%s3011_s14 + $0x88] sm:$0xff]  ;;  %s2708_s28 = sshll.u32 %s2886_s19, 8  ;;  %s2017_s19 = scalar_lea.sflag [#allocation3], %s203_s23 }
  0x20   : > { %v235_v51 = vld [vmem:[%s3011_s14 + $0x98] sm:$0xff]  ;;  %v3023_v52 = vpack.c.bf16 %v234_v48, %v232_v47  ;;  %v2642_v56 = vld [vmem:[%s3980_s2 + $0xf4] sm:$0xf]  ;;  %v2624_v60 = vld [vmem:[%s3980_s2 + $0x64] sm:$0xf]  ;;  %s2028_s5 = scalar_lea.hbm %s3982_s4, %s2708_s28  ;;  %s2794_s11 = scalar_lea.hbm %s3982_s4, 512 }
  0x21   : > { %v3025_v53 = vpack.c.bf16 %v235_v51, %v233_v50  ;;  %v2175_v55 = vld [vmem:[%s3980_s2 + $0x78] sm:$0xf0]  ;;  %v2167_v61 = vld [vmem:[%s3980_s2 + $0x68] sm:$0xf0]  ;;  %v2640_v62 = vld [vmem:[%s3980_s2 + $0xe4] sm:$0xf] }
  0x22   : > { %2712 = vmatpush.bf16.msra.mxu2 %v2150_v22  ;;  %475 = vmatpush.bf16.msra.mxu0 %v2150_v22  ;;  %v2178_v57 = vor.u32 %v2626_v54, %v2175_v55  ;;  %v2239_v58 = vld [vmem:[%s3980_s2 + $0xf8] sm:$0xf0]  ;;  %v2170_v63 = vor.u32 %v2624_v60, %v2167_v61  ;;  %v2231_v0 = vld [vmem:[%s3980_s2 + $0xe8] sm:$0xf0]  ;;  %v2622_v2 = vld [vmem:[%s3980_s2 + $0x54] sm:$0xf] }
  0x23   : > { %2720 = vmatpush.bf16.msra.mxu3 %v2214_v23  ;;  %524 = vmatpush.bf16.msra.mxu1 %v2214_v23  ;;  %v2242_v59 = vor.u32 %v2642_v56, %v2239_v58  ;;  %v2234_v1 = vor.u32 %v2640_v62, %v2231_v0  ;;  %v2159_v3 = vld [vmem:[%s3980_s2 + $0x58] sm:$0xf0]  ;;  %v2638_v4 = vld [vmem:[%s3980_s2 + $0xd4] sm:$0xf]  ;;  %v2620_v8 = vld [vmem:[%s3980_s2 + $0x44] sm:$0xf] }
  0x24   : > { %v2223_v5 = vld [vmem:[%s3980_s2 + $0xd8] sm:$0xf0]  ;;  %v2162_v6 = vor.u32 %v2622_v2, %v2159_v3  ;;  %v2151_v9 = vld [vmem:[%s3980_s2 + $0x48] sm:$0xf0]  ;;  %v2636_v10 = vld [vmem:[%s3980_s2 + $0xc4] sm:$0xf] }
  0x25   : > { %v2226_v7 = vor.u32 %v2638_v4, %v2223_v5  ;;  %v2215_v11 = vld [vmem:[%s3980_s2 + $0xc8] sm:$0xf0]  ;;  %v236_v12 = vld [vmem:[%s3011_s14 + $0xa0] sm:$0xff]  ;;  %v238_v13 = vld [vmem:[%s3011_s14 + $0xb0] sm:$0xff]  ;;  %v2154_v16 = vor.u32 %v2620_v8, %v2151_v9 }
  0x26   : > { %2713 = vmatpush.bf16.msra.mxu2 %v2142_v28  ;;  %476 = vmatpush.bf16.msra.mxu0 %v2142_v28  ;;  %v237_v14 = vld [vmem:[%s3011_s14 + $0xa8] sm:$0xff]  ;;  %v239_v15 = vld [vmem:[%s3011_s14 + $0xb8] sm:$0xff]  ;;  %v2218_v17 = vor.u32 %v2636_v10, %v2215_v11  ;;  %v3081_v18 = vpack.c.bf16 %v238_v13, %v236_v12  ;;  %v2618_v20 = vld [vmem:[%s3980_s2 + $0x34] sm:$0xf] }
  0x27   : > { %2721 = vmatpush.bf16.msra.mxu3 %v2206_v29  ;;  %525 = vmatpush.bf16.msra.mxu1 %v2206_v29  ;;  %v3083_v19 = vpack.c.bf16 %v239_v15, %v237_v14  ;;  %v2143_v21 = vld [vmem:[%s3980_s2 + $0x38] sm:$0xf0]  ;;  %v2634_v22 = vld [vmem:[%s3980_s2 + $0xb4] sm:$0xf]  ;;  %v2616_v26 = vld [vmem:[%s3980_s2 + $0x24] sm:$0xf] }
  0x28   : > { %v2146_v23 = vor.u32 %v2618_v20, %v2143_v21  ;;  %v2207_v24 = vld [vmem:[%s3980_s2 + $0xb8] sm:$0xf0]  ;;  %v2135_v27 = vld [vmem:[%s3980_s2 + $0x28] sm:$0xf0]  ;;  %v2632_v28 = vld [vmem:[%s3980_s2 + $0xa4] sm:$0xf] }
  0x29   : > { %v2210_v25 = vor.u32 %v2634_v22, %v2207_v24  ;;  %v2138_v29 = vor.u32 %v2616_v26, %v2135_v27  ;;  %v2199_v30 = vld [vmem:[%s3980_s2 + $0xa8] sm:$0xf0]  ;;  %v2614_v32 = vld [vmem:[%s3980_s2 + $0x14] sm:$0xf]  ;;  %v2127_v33 = vld [vmem:[%s3980_s2 + $0x18] sm:$0xf0] }
  0x2a   : > { %2714 = vmatpush.bf16.msra.mxu2 %v2134_v34  ;;  %477 = vmatpush.bf16.msra.mxu0 %v2134_v34  ;;  %v2202_v31 = vor.u32 %v2632_v28, %v2199_v30  ;;  %v2630_v34 = vld [vmem:[%s3980_s2 + $0x94] sm:$0xf]  ;;  %v216_v36 = vld [vmem:[%s3011_s14] sm:$0xff]  ;;  %v2130_v38 = vor.u32 %v2614_v32, %v2127_v33  ;;  %v2119_v42 = vld [vmem:[%s3980_s2 + $0x8] sm:$0xf0] }
  0x2b   : > { %2722 = vmatpush.bf16.msra.mxu3 %v2198_v35  ;;  %526 = vmatpush.bf16.msra.mxu1 %v2198_v35  ;;  %v2191_v35 = vld [vmem:[%s3980_s2 + $0x98] sm:$0xf0]  ;;  %v218_v37 = vld [vmem:[%s3011_s14 + $0x10] sm:$0xff]  ;;  %v2628_v43 = vld [vmem:[%s3980_s2 + $0x84] sm:$0xf] }
  0x2c   : > { %v296_v39 = vpack.c.bf16 %v218_v37, %v216_v36  ;;  %v2183_v44 = vld [vmem:[%s3980_s2 + $0x88] sm:$0xf0]  ;;  %v240_v45 = vld [vmem:[%s3011_s14 + $0xc0] sm:$0xff]  ;;  %v243_v48 = vld [vmem:[%s3011_s14 + $0xd8] sm:$0xff] }
  0x2d   : > { %v241_v47 = vld [vmem:[%s3011_s14 + $0xc8] sm:$0xff]  ;;  %v2186_v50 = vor.u32 %v2628_v43, %v2183_v44  ;;  %v219_v56 = vld [vmem:[%s3011_s14 + $0x18] sm:$0xff]  ;;  %v220_v58 = vld [vmem:[%s3011_s14 + $0x20] sm:$0xff] }
  0x2e   : > { %2715 = vmatpush.bf16.msra.mxu2 %v2126_v40  ;;  %478 = vmatpush.bf16.msra.mxu0 %v2126_v40  ;;  %v2194_v40 = vor.u32 %v2630_v34, %v2191_v35  ;;  %v309_v54 = vpack.c.bf16 %v243_v48, %v241_v47  ;;  %v217_v55 = vld [vmem:[%s3011_s14 + $0x8] sm:$0xff]  ;;  %v244_v61 = vld [vmem:[%s3011_s14 + $0xe0] sm:$0xff]  ;;  %v246_v62 = vld [vmem:[%s3011_s14 + $0xf0] sm:$0xff] }
  0x2f   : > { %2723 = vmatpush.bf16.msra.mxu3 %v2190_v41  ;;  %527 = vmatpush.bf16.msra.mxu1 %v2190_v41  ;;  %v2612_v41 = vld [vmem:[%s3980_s2 + $0x4] sm:$0xf]  ;;  %v247_v0 = vld [vmem:[%s3011_s14 + $0xf8] sm:$0xff]  ;;  %v221_v3 = vld [vmem:[%s3011_s14 + $0x28] sm:$0xff] }
  0x30   : > { %v223_v4 = vld [vmem:[%s3011_s14 + $0x38] sm:$0xff]  ;;  %v225_v9 = vld [vmem:[%s3011_s14 + $0x48] sm:$0xff]  ;;  %v228_v12 = vld [vmem:[%s3011_s14 + $0x60] sm:$0xff] }
  0x31   : > { %v299_v5 = vpack.c.bf16 %v223_v4, %v221_v3  ;;  %v227_v10 = vld [vmem:[%s3011_s14 + $0x58] sm:$0xff]  ;;  %v230_v13 = vld [vmem:[%s3011_s14 + $0x70] sm:$0xff]  ;;  %v229_v15 = vld [vmem:[%s3011_s14 + $0x68] sm:$0xff] }
  0x32   : > { %2716 = vmatpush.bf16.msra.mxu2 %v2118_v46  ;;  %479 = vmatpush.bf16.msra.mxu0 %v2118_v46  ;;  %v242_v46 = vld [vmem:[%s3011_s14 + $0xd0] sm:$0xff]  ;;  %v301_v11 = vpack.c.bf16 %v227_v10, %v225_v9  ;;  %v302_v14 = vpack.c.bf16 %v230_v13, %v228_v12 }
  0x33   : > { %2724 = vmatpush.bf16.msra.mxu3 %v2182_v49  ;;  %528 = vmatpush.bf16.msra.mxu1 %v2182_v49  ;;  %v2122_v49 = vor.u32 %v2612_v41, %v2119_v42  ;;  %v308_v51 = vpack.c.bf16 %v242_v46, %v240_v45 }
  0x35   : > { %500 = vmatmul.bf16.vlgmr.msra.gmra.mxu2 %v3023_v52  ;;  %480 = vmatmul.bf16.vlgmr.msra.gmra.mxu0 %v296_v39 }
  0x36   : > { %549 = vmatmul.bf16.vlgmr.msra.gmra.mxu3 %v3025_v53  ;;  %570 = vmatpush.bf16.msrb.mxu2 %v2178_v57  ;;  %v297_v57 = vpack.c.bf16 %v219_v56, %v217_v55 }
  0x37   : > { %619 = vmatpush.bf16.msrb.mxu3 %v2242_v59  ;;  %v222_v59 = vld [vmem:[%s3011_s14 + $0x30] sm:$0xff] }
  0x38   : > { %529 = vmatmul.bf16.vlgmr.msra.gmra.mxu1 %v297_v57  ;;  %v298_v60 = vpack.c.bf16 %v222_v59, %v220_v58 }
  0x3a   : > { %571 = vmatpush.bf16.msrb.mxu2 %v2170_v63  ;;  %v245_v63 = vld [vmem:[%s3011_s14 + $0xe8] sm:$0xff] }
  0x3b   : > { %620 = vmatpush.bf16.msrb.mxu3 %v2234_v1  ;;  %v310_v1 = vpack.c.bf16 %v246_v62, %v244_v61  ;;  %v311_v2 = vpack.c.bf16 %v247_v0, %v245_v63 }
  0x3e   : > { %572 = vmatpush.bf16.msrb.mxu2 %v2162_v6  ;;  %v224_v6 = vld [vmem:[%s3011_s14 + $0x40] sm:$0xff] }
  0x3f   : > { %621 = vmatpush.bf16.msrb.mxu3 %v2226_v7  ;;  %v226_v7 = vld [vmem:[%s3011_s14 + $0x50] sm:$0xff] }
  0x40   : > { %v300_v8 = vpack.c.bf16 %v226_v7, %v224_v6 }
  0x42   : > { %573 = vmatpush.bf16.msrb.mxu2 %v2154_v16  ;;  %v231_v16 = vld [vmem:[%s3011_s14 + $0x78] sm:$0xff]  ;;  %s2603_s14 = sshll.u32 %s2987_s20, 6 }
  0x43   : > { %622 = vmatpush.bf16.msrb.mxu3 %v2218_v17  ;;  %v303_v17 = vpack.c.bf16 %v231_v16, %v229_v15  ;;  %s3184_s9 = scalar_lea.vmem %s3979_s1, %s2603_s14  ;;  %s2031_s14 = sshll.u32 %s2028_s5, 4  ;;  %s2032_s14 = int_to_ptr.hbm [resolvable:$true] %s2031_s14 }
  0x44   : > { %s2788_s7 = sshra.s32 %s2032_s14, 4  ;;  %s2789_s7 = int_to_ptr.hbm [resolvable:$true] %s2788_s7 }
  0x45   : > { %505 = vmatmul.bf16.gmra.mxu2 %v3081_v18  ;;  %485 = vmatmul.bf16.gmra.mxu0 %v298_v60  ;;  %s2790_s8 = scalar_lea.hbm %s2789_s7, 256  ;;  %p2795_p0 = scmp.lt.s32.totalorder %s2789_s7, %s3982_s4 }
  0x46   : > { %554 = vmatmul.bf16.gmra.mxu3 %v3083_v19  ;;  %574 = vmatpush.bf16.msrb.mxu2 %v2146_v23  ;;  %p2791_p11 = scmp.ne.s32.totalorder %s2789_s7, %s2790_s8  ;;  %p2796_p1 = scmp.lt.s32.totalorder %s2794_s11, %s2790_s8 }
  0x47   : > { %623 = vmatpush.bf16.msrb.mxu3 %v2210_v25 }
  0x48   : > { %534 = vmatmul.bf16.gmra.mxu1 %v299_v5  ;;  %p2792_p12 = pnand %p2791_p11, %p2903_p5  ;;  %p2797_p2 = por %p2796_p1, %p2795_p0 }
  0x4a   : > { %575 = vmatpush.bf16.msrb.mxu2 %v2138_v29  ;;  %p2793_p13 = pneg %p2792_p12 }
  0x4b   : > { %624 = vmatpush.bf16.msrb.mxu3 %v2202_v31 }
  0x4c   : > { %p2798_p3 = pnand %p2797_p2, %p2793_p13 }
  0x4e   : > { %576 = vmatpush.bf16.msrb.mxu2 %v2130_v38 }
  0x4f   : > { %625 = vmatpush.bf16.msrb.mxu3 %v2194_v40 }
  0x52   : > { %577 = vmatpush.bf16.msrb.mxu2 %v2122_v49 }
  0x53   : > { %626 = vmatpush.bf16.msrb.mxu3 %v2186_v50 }
  0x55   : > { %510 = vmatmul.bf16.gmra.mxu2 %v308_v51  ;;  %490 = vmatmul.bf16.gmra.mxu0 %v300_v8 }
  0x56   : > { %559 = vmatmul.bf16.gmra.mxu3 %v309_v54 }
  0x58   : > { %539 = vmatmul.bf16.gmra.mxu1 %v301_v11 }
  0x65   : > { %515 = vmatmul.bf16.gmra.mxu2 %v310_v1  ;;  %495 = vmatmul.bf16.gmra.mxu0 %v302_v14 }
  0x66   : > { %564 = vmatmul.bf16.gmra.mxu3 %v311_v2 }
  0x68   : > { %544 = vmatmul.bf16.gmra.mxu1 %v303_v17 }
  0x75   : > { %578 = vmatmul.bf16.vlgmr.msrb.gmra.mxu2 %v296_v39 }
  0x76   : > { %627 = vmatmul.bf16.vlgmr.msrb.gmra.mxu3 %v297_v57 }
  0x85   : > { %583 = vmatmul.bf16.gmra.mxu2 %v298_v60 }
  0x86   : > { %632 = vmatmul.bf16.gmra.mxu3 %v299_v5 }
  0x95   : > { %588 = vmatmul.bf16.gmra.mxu2 %v300_v8 }
  0x96   : > { %637 = vmatmul.bf16.gmra.mxu3 %v301_v11 }
  0xa5   : > { %593 = vmatmul.bf16.gmra.mxu2 %v302_v14 }
  0xa6   : > { %642 = vmatmul.bf16.gmra.mxu3 %v303_v17 }
  0xb5   : > { %598 = vmatmul.bf16.gmra.mxu2 %v3023_v52  ;;  %v530_v32 = vpop.f32.mrf.mxu1 }
  0xb6   : > { %647 = vmatmul.bf16.gmra.mxu3 %v3025_v53  ;;  %v481_v53 = vpop.f32.mrf.mxu0 }
  0xb7   : > { %v3163_v33 = vadd.f32 %v530_v32, %v481_v53 }
  0xb8   : > { %v501_v20 = vpop.f32.mrf.mxu2 }
  0xb9   : > { %v550_v21 = vpop.f32.mrf.mxu3 }
  0xba   : > { %v551_v22 = vadd.f32 %v550_v21, %v501_v20 }
  0xbe   : > { %v483_v35 = vpop.f32.mrf.mxu0 }
  0xc0   : > { %v503_v23 = vpop.f32.mrf.mxu2 }
  0xc1   : > { %v552_v24 = vpop.f32.mrf.mxu3 }
  0xc2   : > { %v553_v55 = vadd.f32 %v552_v24, %v503_v23 }
  0xc4   : > { %v676_v58 = vpack.c.bf16 %v553_v55, %v551_v22 }
  0xc5   : > { %603 = vmatmul.bf16.gmra.mxu2 %v3081_v18 }
  0xc6   : > { %652 = vmatmul.bf16.gmra.mxu3 %v3083_v19  ;;  %v532_v19 = vpop.f32.mrf.mxu1  ;;  %v486_v40 = vpop.f32.mrf.mxu0 }
  0xc7   : > { %v533_v24 = vadd.f32 %v532_v19, %v483_v35 }
  0xc8   : > { %v506_v25 = vpop.f32.mrf.mxu2 }
  0xc9   : > { %v555_v26 = vpop.f32.mrf.mxu3 }
  0xca   : > { %v556_v49 = vadd.f32 %v555_v26, %v506_v25 }
  0xce   : > { %v535_v41 = vpop.f32.mrf.mxu1 }
  0xcf   : > { %v536_v22 = vadd.f32 %v535_v41, %v486_v40  ;;  %v3187_v41 = vld [vmem:[%s3184_s9] sm:$0xff] }
  0xd0   : > { %v508_v27 = vpop.f32.mrf.mxu2  ;;  %4002 = vst [vmem:[#allocation5_spill] sm:$0xff] %v3187_v41 }
  0xd1   : > { %v557_v28 = vpop.f32.mrf.mxu3 }
  0xd2   : > { %v558_v45 = vadd.f32 %v557_v28, %v508_v27 }
  0xd4   : > { %v678_v56 = vpack.c.bf16 %v558_v45, %v556_v49 }
  0xd5   : > { %608 = vmatmul.bf16.gmra.mxu2 %v308_v51  ;;  %v488_v51 = vpop.f32.mrf.mxu0 }
  0xd6   : > { %657 = vmatmul.bf16.gmra.mxu3 %v309_v54  ;;  %v537_v54 = vpop.f32.mrf.mxu1 }
  0xd7   : > { %v538_v23 = vadd.f32 %v537_v54, %v488_v51 }
  0xd8   : > { %v511_v29 = vpop.f32.mrf.mxu2 }
  0xd9   : > { %v560_v30 = vpop.f32.mrf.mxu3  ;;  %v670_v26 = vpack.c.bf16 %v538_v23, %v536_v22  ;;  %v2359_v22 = vld [vmem:[%s3980_s2 + $0x168] sm:$0xf0] }
  0xda   : > { %v561_v44 = vadd.f32 %v560_v30, %v511_v29  ;;  %v668_v29 = vpack.c.bf16 %v533_v24, %v3163_v33  ;;  %v2349_v24 = vld [vmem:[%s3980_s2 + $0x150] sm:$0xf] }
  0xdd   : > { %v491_v60 = vpop.f32.mrf.mxu0 }
  0xde   : > { %v540_v61 = vpop.f32.mrf.mxu1 }
  0xdf   : > { %v541_v14 = vadd.f32 %v540_v61, %v491_v60 }
  0xe0   : > { %v513_v52 = vpop.f32.mrf.mxu2 }
  0xe1   : > { %v562_v31 = vpop.f32.mrf.mxu3 }
  0xe2   : > { %v563_v42 = vadd.f32 %v562_v31, %v513_v52 }
  0xe4   : > { %v680_v47 = vpack.c.bf16 %v563_v42, %v561_v44 }
  0xe5   : > { %613 = vmatmul.bf16.gmra.mxu2 %v310_v1  ;;  %v493_v1 = vpop.f32.mrf.mxu0 }
  0xe6   : > { %662 = vmatmul.bf16.gmra.mxu3 %v311_v2  ;;  %v542_v2 = vpop.f32.mrf.mxu1 }
  0xe7   : > { %v543_v15 = vadd.f32 %v542_v2, %v493_v1  ;;  %v3195_v1 = vld [vmem:[%s3184_s9 + $0x10] sm:$0xff] }
  0xe8   : > { %v516_v34 = vpop.f32.mrf.mxu2  ;;  %4004 = vst [vmem:[#allocation7_spill] sm:$0xff] %v3195_v1 }
  0xe9   : > { %v565_v18 = vpop.f32.mrf.mxu3  ;;  %v672_v21 = vpack.c.bf16 %v543_v15, %v541_v14  ;;  %v3238_v15 = vld [vmem:[%s3184_s9 + $0x38] sm:$0xff] }
  0xea   : > { %v566_v38 = vadd.f32 %v565_v18, %v516_v34 }
  0xed   : > { %v496_v5 = vpop.f32.mrf.mxu0 }
  0xee   : > { %v545_v6 = vpop.f32.mrf.mxu1 }
  0xef   : > { %v546_v12 = vadd.f32 %v545_v6, %v496_v5 }
  0xf0   : > { %v518_v36 = vpop.f32.mrf.mxu2 }
  0xf1   : > { %v567_v37 = vpop.f32.mrf.mxu3 }
  0xf2   : > { %v568_v39 = vadd.f32 %v567_v37, %v518_v36 }
  0xf4   : > { %v682_v43 = vpack.c.bf16 %v568_v39, %v566_v38 }
  0xf5   : > { %v498_v10 = vpop.f32.mrf.mxu0 }
  0xf6   : > { %738 = vmatpush.bf16.msrb.mxu0 %v682_v43  ;;  %v547_v11 = vpop.f32.mrf.mxu1 }
  0xf7   : > { %v548_v13 = vadd.f32 %v547_v11, %v498_v10 }
  0xf8   : > { %v579_v46 = vpop.f32.mrf.mxu2 }
  0xf9   : > { %v628_v48 = vpop.f32.mrf.mxu3  ;;  %v674_v17 = vpack.c.bf16 %v548_v13, %v546_v12  ;;  %v3206_v12 = vld [vmem:[%s3184_s9 + $0x18] sm:$0xff] }
  0xfa   : > { %v3165_v50 = vadd.f32 %v628_v48, %v579_v46  ;;  %739 = vmatpush.bf16.msrb.mxu0 %v680_v47  ;;  %v3191_v48 = vld [vmem:[%s3184_s9 + $0x8] sm:$0xff]  ;;  %4005 = vst [vmem:[#allocation8_spill] sm:$0xff] %v3206_v12  ;;  %v2367_v13 = vld [vmem:[%s3980_s2 + $0x178] sm:$0xf0] }
  0xfb   : > { %4003 = vst [vmem:[#allocation6_spill] sm:$0xff] %v3191_v48 }
  0xfe   : > { %740 = vmatpush.bf16.msrb.mxu0 %v678_v56 }
 0x100   : > { %v3167_v57 = vpop.f32.mrf.mxu2 }
 0x101   : > { %v3169_v59 = vpop.f32.mrf.mxu3 }
 0x102   : > { %741 = vmatpush.bf16.msrb.mxu0 %v676_v58 }
 0x106   : > { %742 = vmatpush.bf16.msrb.mxu0 %v674_v17  ;;  %v2657_v17 = vld [vmem:[%s3980_s2 + $0x164] sm:$0xf0] }
 0x108   : > { %v584_v62 = vpop.f32.mrf.mxu2 }
 0x109   : > { %v633_v63 = vpop.f32.mrf.mxu3 }
 0x10a   : > { %v3171_v0 = vadd.f32 %v633_v63, %v584_v62  ;;  %743 = vmatpush.bf16.msrb.mxu0 %v672_v21 }
 0x10e   : > { %744 = vmatpush.bf16.msrb.mxu0 %v670_v26  ;;  %v2654_v26 = vld [vmem:[%s3980_s2 + $0x154] sm:$0xf] }
 0x110   : > { %v3173_v3 = vpop.f32.mrf.mxu2 }
 0x111   : > { %v3175_v4 = vpop.f32.mrf.mxu3 }
 0x112   : > { %745 = vmatpush.bf16.msrb.mxu0 %v668_v29  ;;  %v636_v6 = vadd.f32 %v3175_v4, %v3173_v3  ;;  %v3211_v3 = vld [vmem:[%s3184_s9 + $0x20] sm:$0xff]  ;;  %v2658_v4 = vld [vmem:[%s3980_s2 + $0x174] sm:$0xf] }
 0x113   : > { %4006 = vst [vmem:[#allocation9_spill] sm:$0xff] %v3211_v3  ;;  %v2370_v14 = vor.u32 %v2658_v4, %v2367_v13  ;;  %v2646_v4 = vld [vmem:[%s3980_s2 + $0x114] sm:$0xf] }
 0x114   : > { %v671_v10 = vpack.c.bf16 %v636_v6, %v3171_v0  ;;  %v2659_v0 = vld [vmem:[%s3980_s2 + $0x174] sm:$0xf0] }
 0x115   : > { %746 = vmatmul.bf16.vlgmr.msrb.gmra.mxu0 %v3187_v41 }
 0x116   : > { %1175 = vmatpush.bf16.msra.mxu0 %v2370_v14 }
 0x118   : > { %v589_v7 = vpop.f32.mrf.mxu2 }
 0x119   : > { %v638_v8 = vpop.f32.mrf.mxu3 }
 0x11a   : > { %v3177_v9 = vadd.f32 %v638_v8, %v589_v7  ;;  %v631_v8 = vadd.f32 %v3169_v59, %v3167_v57  ;;  %v3216_v57 = vld [vmem:[%s3184_s9 + $0x28] sm:$0xff]  ;;  %v2365_v59 = vld [vmem:[%s3980_s2 + $0x170] sm:$0xf] }
 0x11b   : > { %4007 = vst [vmem:[#allocation10_spill] sm:$0xff] %v3216_v57 }
 0x11c   : > { %v669_v11 = vpack.c.bf16 %v631_v8, %v3165_v50  ;;  %v3221_v50 = vld [vmem:[%s3184_s9 + $0x30] sm:$0xff] }
 0x11d   : > { %4008 = vst [vmem:[#allocation11_spill] sm:$0xff] %v3221_v50  ;;  %v2317_v8 = vld [vmem:[%s3980_s2 + $0x110] sm:$0xf] }
 0x120   : > { %v591_v16 = vpop.f32.mrf.mxu2 }
 0x121   : > { %v640_v20 = vpop.f32.mrf.mxu3 }
 0x122   : > { %v641_v2 = vadd.f32 %v640_v20, %v591_v16  ;;  %v2357_v16 = vld [vmem:[%s3980_s2 + $0x160] sm:$0xf]  ;;  %v2656_v20 = vld [vmem:[%s3980_s2 + $0x164] sm:$0xf] }
 0x123   : > { %v2358_v21 = vor.u32 %v2657_v17, %v2357_v16  ;;  %v2362_v23 = vor.u32 %v2656_v20, %v2359_v22  ;;  %v2670_v16 = vld [vmem:[%s3980_s2 + $0x1d4] sm:$0xf]  ;;  %v2415_v17 = vld [vmem:[%s3980_s2 + $0x1d8] sm:$0xf0]  ;;  %v2309_v20 = vld [vmem:[%s3980_s2 + $0x100] sm:$0xf] }
 0x124   : > { %v673_v7 = vpack.c.bf16 %v641_v2, %v3177_v9  ;;  %v2366_v9 = vor.u32 %v2659_v0, %v2365_v59  ;;  %v2672_v2 = vld [vmem:[%s3980_s2 + $0x1e4] sm:$0xf]  ;;  %v2671_v0 = vld [vmem:[%s3980_s2 + $0x1d4] sm:$0xf0]  ;;  %v2418_v22 = vor.u32 %v2670_v16, %v2415_v17 }
 0x125   : > { %751 = vmatmul.bf16.gmra.mxu0 %v3191_v48 }
 0x126   : > { %1077 = vmatpush.bf16.msra.mxu2 %v2366_v9  ;;  %1176 = vmatpush.bf16.msra.mxu0 %v2362_v23  ;;  %v2319_v9 = vld [vmem:[%s3980_s2 + $0x118] sm:$0xf0]  ;;  %v2645_v23 = vld [vmem:[%s3980_s2 + $0x104] sm:$0xf0] }
 0x127   : > { %v2322_v14 = vor.u32 %v2646_v4, %v2319_v9 }
 0x128   : > { %v594_v25 = vpop.f32.mrf.mxu2 }
 0x129   : > { %v643_v27 = vpop.f32.mrf.mxu3 }
 0x12a   : > { %v644_v28 = vadd.f32 %v643_v27, %v594_v25  ;;  %v2655_v25 = vld [vmem:[%s3980_s2 + $0x154] sm:$0xf0]  ;;  %1078 = vmatpush.bf16.msra.mxu2 %v2358_v21 }
 0x12b   : > { %v2350_v27 = vor.u32 %v2655_v25, %v2349_v24  ;;  %v2405_v24 = vld [vmem:[%s3980_s2 + $0x1c0] sm:$0xf]  ;;  %v2669_v25 = vld [vmem:[%s3980_s2 + $0x1c4] sm:$0xf0] }
 0x12e   : > { %1079 = vmatpush.bf16.msra.mxu2 %v2350_v27  ;;  %v2310_v27 = vor.u32 %v2645_v23, %v2309_v20 }
 0x130   : > { %v596_v30 = vpop.f32.mrf.mxu2 }
 0x131   : > { %v645_v52 = vpop.f32.mrf.mxu3 }
 0x132   : > { %v646_v62 = vadd.f32 %v645_v52, %v596_v30  ;;  %v2341_v30 = vld [vmem:[%s3980_s2 + $0x140] sm:$0xf]  ;;  %v2653_v52 = vld [vmem:[%s3980_s2 + $0x144] sm:$0xf0] }
 0x134   : > { %v675_v5 = vpack.c.bf16 %v646_v62, %v644_v28  ;;  %v2351_v28 = vld [vmem:[%s3980_s2 + $0x158] sm:$0xf0] }
 0x135   : > { %756 = vmatmul.bf16.gmra.mxu0 %v3195_v1  ;;  %v2354_v29 = vor.u32 %v2654_v26, %v2351_v28  ;;  %v2644_v28 = vld [vmem:[%s3980_s2 + $0x104] sm:$0xf] }
 0x137   : > { %1177 = vmatpush.bf16.msra.mxu0 %v2354_v29  ;;  %v2311_v29 = vld [vmem:[%s3980_s2 + $0x108] sm:$0xf0] }
 0x138   : > { %v599_v31 = vpop.f32.mrf.mxu2 }
 0x139   : > { %v648_v53 = vpop.f32.mrf.mxu3 }
 0x13a   : > { %v649_v32 = vadd.f32 %v648_v53, %v599_v31  ;;  %v2652_v31 = vld [vmem:[%s3980_s2 + $0x144] sm:$0xf]  ;;  %v2343_v53 = vld [vmem:[%s3980_s2 + $0x148] sm:$0xf0] }
 0x140   : > { %v601_v34 = vpop.f32.mrf.mxu2 }
 0x141   : > { %v650_v18 = vpop.f32.mrf.mxu3 }
 0x142   : > { %v651_v60 = vadd.f32 %v650_v18, %v601_v34  ;;  %v2675_v34 = vld [vmem:[%s3980_s2 + $0x1f4] sm:$0xf0]  ;;  %v2342_v18 = vor.u32 %v2653_v52, %v2341_v30  ;;  %v2668_v30 = vld [vmem:[%s3980_s2 + $0x1c4] sm:$0xf]  ;;  %v2406_v52 = vor.u32 %v2669_v25, %v2405_v24 }
 0x144   : > { %v677_v63 = vpack.c.bf16 %v651_v60, %v649_v32  ;;  %v2429_v32 = vld [vmem:[%s3980_s2 + $0x1f0] sm:$0xf]  ;;  %1080 = vmatpush.bf16.msra.mxu2 %v2342_v18  ;;  %v2673_v60 = vld [vmem:[%s3980_s2 + $0x1e4] sm:$0xf0] }
 0x145   : > { %761 = vmatmul.bf16.gmra.mxu0 %v3206_v12 }
 0x148   : > { %v604_v36 = vpop.f32.mrf.mxu2 }
 0x149   : > { %v653_v37 = vpop.f32.mrf.mxu3 }
 0x14a   : > { %v654_v58 = vadd.f32 %v653_v37, %v604_v36  ;;  %v2430_v36 = vor.u32 %v2675_v34, %v2429_v32  ;;  %v2674_v37 = vld [vmem:[%s3980_s2 + $0x1f4] sm:$0xf]  ;;  %v2314_v32 = vor.u32 %v2644_v28, %v2311_v29 }
 0x14c   : > { %1126 = vmatpush.bf16.msra.mxu3 %v2430_v36  ;;  %v2397_v36 = vld [vmem:[%s3980_s2 + $0x1b0] sm:$0xf] }
 0x150   : > { %v606_v35 = vpop.f32.mrf.mxu2 }
 0x151   : > { %v655_v19 = vpop.f32.mrf.mxu3 }
 0x152   : > { %v656_v55 = vadd.f32 %v655_v19, %v606_v35  ;;  %v2431_v35 = vld [vmem:[%s3980_s2 + $0x1f8] sm:$0xf0]  ;;  %v2346_v19 = vor.u32 %v2652_v31, %v2343_v53  ;;  %v2407_v31 = vld [vmem:[%s3980_s2 + $0x1c8] sm:$0xf0] }
 0x153   : > { %v2410_v34 = vor.u32 %v2668_v30, %v2407_v31 }
 0x154   : > { %v679_v61 = vpack.c.bf16 %v656_v55, %v654_v58  ;;  %1178 = vmatpush.bf16.msra.mxu0 %v2346_v19  ;;  %v2421_v55 = vld [vmem:[%s3980_s2 + $0x1e0] sm:$0xf] }
 0x155   : > { %766 = vmatmul.bf16.gmra.mxu0 %v3211_v3  ;;  %v2422_v62 = vor.u32 %v2673_v60, %v2421_v55  ;;  %v2663_v55 = vld [vmem:[%s3980_s2 + $0x194] sm:$0xf0]  ;;  %v2383_v60 = vld [vmem:[%s3980_s2 + $0x198] sm:$0xf0] }
 0x157   : > { %1127 = vmatpush.bf16.msra.mxu3 %v2422_v62 }
 0x158   : > { %v609_v38 = vpop.f32.mrf.mxu2 }
 0x159   : > { %v658_v39 = vpop.f32.mrf.mxu3 }
 0x15a   : > { %v659_v54 = vadd.f32 %v658_v39, %v609_v38  ;;  %v3293_v38 = vld [vmem:[%s3981_s3] sm:$0x3]  ;;  %v2333_v39 = vld [vmem:[%s3980_s2 + $0x130] sm:$0xf] }
 0x15b   : > { %v3440_v23 = vperm.slane %v3293_v38, 1 }
 0x160   : > { %v611_v33 = vpop.f32.mrf.mxu2 }
 0x161   : > { %v660_v40 = vpop.f32.mrf.mxu3 }
 0x162   : > { %v661_v49 = vadd.f32 %v660_v40, %v611_v33  ;;  %v2651_v33 = vld [vmem:[%s3980_s2 + $0x134] sm:$0xf0]  ;;  %v2434_v40 = vor.u32 %v2674_v37, %v2431_v35  ;;  %v2666_v35 = vld [vmem:[%s3980_s2 + $0x1b4] sm:$0xf] }
 0x163   : > { %v2667_v37 = vld [vmem:[%s3980_s2 + $0x1b4] sm:$0xf0] }
 0x164   : > { %v681_v56 = vpack.c.bf16 %v661_v49, %v659_v54  ;;  %v2649_v54 = vld [vmem:[%s3980_s2 + $0x124] sm:$0xf0]  ;;  %v2398_v19 = vor.u32 %v2667_v37, %v2397_v36 }
 0x165   : > { %771 = vmatmul.bf16.gmra.mxu0 %v3216_v57 }
 0x168   : > { %v614_v42 = vpop.f32.mrf.mxu2 }
 0x169   : > { %v663_v43 = vpop.f32.mrf.mxu3 }
 0x16a   : > { %v664_v46 = vadd.f32 %v663_v43, %v614_v42  ;;  %v2650_v42 = vld [vmem:[%s3980_s2 + $0x134] sm:$0xf]  ;;  %v2335_v43 = vld [vmem:[%s3980_s2 + $0x138] sm:$0xf0] }
 0x170   : > { %v616_v44 = vpop.f32.mrf.mxu2 }
 0x171   : > { %v665_v45 = vpop.f32.mrf.mxu3 }
 0x172   : > { %v666_v47 = vadd.f32 %v665_v45, %v616_v44  ;;  %v3308_v44 = vperm.slane %v3293_v38, 0  ;;  %v2334_v45 = vor.u32 %v2651_v33, %v2333_v39  ;;  %v2399_v39 = vld [vmem:[%s3980_s2 + $0x1b8] sm:$0xf0] }
 0x174   : > { %v683_v51 = vpack.c.bf16 %v666_v47, %v664_v46  ;;  %v2338_v46 = vor.u32 %v2650_v42, %v2335_v43  ;;  %1081 = vmatpush.bf16.msra.mxu2 %v2334_v45  ;;  %v2389_v42 = vld [vmem:[%s3980_s2 + $0x1a0] sm:$0xf]  ;;  %v2665_v43 = vld [vmem:[%s3980_s2 + $0x1a4] sm:$0xf0]  ;;  %v2664_v45 = vld [vmem:[%s3980_s2 + $0x1a4] sm:$0xf] }
 0x175   : > { %776 = vmatmul.bf16.gmra.mxu0 %v3221_v50 }
 0x176   : > { %787 = vmatpush.bf16.msrb.mxu1 %v683_v51  ;;  %1179 = vmatpush.bf16.msra.mxu0 %v2338_v46  ;;  %v2325_v51 = vld [vmem:[%s3980_s2 + $0x120] sm:$0xf]  ;;  %v2390_v46 = vor.u32 %v2665_v43, %v2389_v42 }
 0x177   : > { %v2326_v58 = vor.u32 %v2649_v54, %v2325_v51  ;;  %v2381_v54 = vld [vmem:[%s3980_s2 + $0x190] sm:$0xf] }
 0x179   : > { %1082 = vmatpush.bf16.msra.mxu2 %v2326_v58  ;;  %v2382_v58 = vor.u32 %v2663_v55, %v2381_v54 }
 0x17a   : > { %788 = vmatpush.bf16.msrb.mxu1 %v681_v56 }
 0x17e   : > { %789 = vmatpush.bf16.msrb.mxu1 %v679_v61  ;;  %v2648_v61 = vld [vmem:[%s3980_s2 + $0x124] sm:$0xf] }
 0x182   : > { %790 = vmatpush.bf16.msrb.mxu1 %v677_v63  ;;  %v2327_v63 = vld [vmem:[%s3980_s2 + $0x128] sm:$0xf0] }
 0x183   : > { %v2330_v6 = vor.u32 %v2648_v61, %v2327_v63 }
 0x185   : > { %781 = vmatmul.bf16.gmra.mxu0 %v3238_v15 }
 0x186   : > { %791 = vmatpush.bf16.msrb.mxu1 %v675_v5  ;;  %v2423_v5 = vld [vmem:[%s3980_s2 + $0x1e8] sm:$0xf0]  ;;  %1180 = vmatpush.bf16.msra.mxu0 %v2330_v6  ;;  %v2661_v6 = vld [vmem:[%s3980_s2 + $0x184] sm:$0xf0] }
 0x18a   : > { %792 = vmatpush.bf16.msrb.mxu1 %v673_v7  ;;  %v2426_v7 = vor.u32 %v2672_v2, %v2423_v5  ;;  %1181 = vmatpush.bf16.msra.mxu0 %v2322_v14  ;;  %v2373_v5 = vld [vmem:[%s3980_s2 + $0x180] sm:$0xf] }
 0x18e   : > { %793 = vmatpush.bf16.msrb.mxu1 %v671_v10  ;;  %v2647_v10 = vld [vmem:[%s3980_s2 + $0x114] sm:$0xf0]  ;;  %1182 = vmatpush.bf16.msra.mxu0 %v2314_v32 }
 0x18f   : > { %v2318_v59 = vor.u32 %v2647_v10, %v2317_v8  ;;  %v2374_v10 = vor.u32 %v2661_v6, %v2373_v5 }
 0x191   : > { %1083 = vmatpush.bf16.msra.mxu2 %v2318_v59 }
 0x192   : > { %794 = vmatpush.bf16.msrb.mxu1 %v669_v11  ;;  %v747_v47 = vpop.f32.mrf.mxu0  ;;  %v2413_v11 = vld [vmem:[%s3980_s2 + $0x1d0] sm:$0xf] }
 0x193   : > { %v748_v49 = vadd.f32 %v747_v47, %v3308_v44  ;;  %v2414_v13 = vor.u32 %v2671_v0, %v2413_v11  ;;  %v2391_v47 = vld [vmem:[%s3980_s2 + $0x1a8] sm:$0xf0] }
 0x194   : > { %v2375_v11 = vld [vmem:[%s3980_s2 + $0x188] sm:$0xf0] }
 0x195   : > { %795 = vmatmul.bf16.vlgmr.msrb.gmra.mxu1 %v3187_v41  ;;  %v836_v56 = vmax.f32 %v748_v49, 0.0  ;;  %1128 = vmatpush.bf16.msra.mxu3 %v2414_v13  ;;  %v2394_v49 = vor.u32 %v2664_v45, %v2391_v47 }
 0x196   : > { %1224 = vmatpush.bf16.msra.mxu1 %v2434_v40  ;;  %1084 = vmatpush.bf16.msra.mxu2 %v2310_v27  ;;  %v2402_v40 = vor.u32 %v2666_v35, %v2399_v39 }
 0x199   : > { %1129 = vmatpush.bf16.msra.mxu3 %v2406_v52 }
 0x19a   : > { %1225 = vmatpush.bf16.msra.mxu1 %v2426_v7  ;;  %v749_v21 = vpop.f32.mrf.mxu0  ;;  %v2660_v7 = vld [vmem:[%s3980_s2 + $0x184] sm:$0xf] }
 0x19b   : > { %v750_v26 = vadd.f32 %v749_v21, %v3308_v44  ;;  %v2378_v59 = vor.u32 %v2660_v7, %v2375_v11 }
 0x19d   : > { %v838_v53 = vmax.f32 %v750_v26, 0.0  ;;  %1130 = vmatpush.bf16.msra.mxu3 %v2398_v19 }
 0x19e   : > { %1226 = vmatpush.bf16.msra.mxu1 %v2418_v22 }
 0x19f   : > { %v901_v18 = vpack.c.bf16 %v838_v53, %v836_v56  ;;  %v2662_v56 = vld [vmem:[%s3980_s2 + $0x194] sm:$0xf] }
 0x1a0   : > { %v2386_v62 = vor.u32 %v2662_v56, %v2383_v60 }
 0x1a1   : > { %1085 = vmatmul.bf16.vlgmr.msra.gmra.mxu2 %v901_v18  ;;  %1183 = vmatmul.bf16.vlgmr.msra.gmra.mxu0 %v901_v18 }
 0x1a2   : > { %1227 = vmatpush.bf16.msra.mxu1 %v2410_v34  ;;  %v752_v33 = vpop.f32.mrf.mxu0  ;;  %1131 = vmatpush.bf16.msra.mxu3 %v2390_v46 }
 0x1a3   : > { %v753_v51 = vadd.f32 %v752_v33, %v3308_v44 }
 0x1a5   : > { %800 = vmatmul.bf16.gmra.mxu1 %v3191_v48  ;;  %v840_v63 = vmax.f32 %v753_v51, 0.0 }
 0x1a6   : > { %1228 = vmatpush.bf16.msra.mxu1 %v2402_v40  ;;  %1132 = vmatpush.bf16.msra.mxu3 %v2382_v58 }
 0x1aa   : > { %1229 = vmatpush.bf16.msra.mxu1 %v2394_v49  ;;  %v754_v61 = vpop.f32.mrf.mxu0  ;;  %1133 = vmatpush.bf16.msra.mxu3 %v2374_v10 }
 0x1ab   : > { %v755_v2 = vadd.f32 %v754_v61, %v3308_v44 }
 0x1ad   : > { %v842_v8 = vmax.f32 %v755_v2, 0.0 }
 0x1ae   : > { %1230 = vmatpush.bf16.msra.mxu1 %v2386_v62 }
 0x1af   : > { %v903_v0 = vpack.c.bf16 %v842_v8, %v840_v63 }
 0x1b1   : > { %1090 = vmatmul.bf16.gmra.mxu2 %v903_v0  ;;  %1188 = vmatmul.bf16.gmra.mxu0 %v903_v0 }
 0x1b2   : > { %1231 = vmatpush.bf16.msra.mxu1 %v2378_v59  ;;  %v757_v4 = vpop.f32.mrf.mxu0 }
 0x1b3   : > { %v758_v9 = vadd.f32 %v757_v4, %v3308_v44 }
 0x1b5   : > { %805 = vmatmul.bf16.gmra.mxu1 %v3195_v1  ;;  %v844_v14 = vmax.f32 %v758_v9, 0.0 }
 0x1ba   : > { %v759_v13 = vpop.f32.mrf.mxu0 }
 0x1bb   : > { %v760_v16 = vadd.f32 %v759_v13, %v3308_v44 }
 0x1bd   : > { %v846_v17 = vmax.f32 %v760_v16, 0.0 }
 0x1bf   : > { %v905_v20 = vpack.c.bf16 %v846_v17, %v844_v14 }
 0x1c1   : > { %1095 = vmatmul.bf16.gmra.mxu2 %v905_v20  ;;  %1193 = vmatmul.bf16.gmra.mxu0 %v905_v20 }
 0x1c2   : > { %v762_v21 = vpop.f32.mrf.mxu0 }
 0x1c3   : > { %v763_v24 = vadd.f32 %v762_v21, %v3308_v44 }
 0x1c5   : > { %810 = vmatmul.bf16.gmra.mxu1 %v3206_v12  ;;  %v848_v27 = vmax.f32 %v763_v24, 0.0 }
 0x1d5   : > { %815 = vmatmul.bf16.gmra.mxu1 %v3211_v3 }
 0x1e5   : > { %820 = vmatmul.bf16.gmra.mxu1 %v3216_v57 }
 0x1f5   : > { %825 = vmatmul.bf16.gmra.mxu1 %v3221_v50 }
 0x205   : > { %830 = vmatmul.bf16.gmra.mxu1 %v3238_v15  ;;  %v764_v15 = vpop.f32.mrf.mxu0 }
 0x206   : > { %v765_v28 = vadd.f32 %v764_v15, %v3308_v44 }
 0x208   : > { %v850_v30 = vmax.f32 %v765_v28, 0.0 }
 0x20a   : > { %v907_v53 = vpack.c.bf16 %v850_v30, %v848_v27 }
 0x20c   : > { %1100 = vmatmul.bf16.gmra.mxu2 %v907_v53  ;;  %1198 = vmatmul.bf16.gmra.mxu0 %v907_v53 }
 0x20d   : > { %v767_v38 = vpop.f32.mrf.mxu0 }
 0x20e   : > { %v768_v18 = vadd.f32 %v767_v38, %v3308_v44 }
 0x210   : > { %v852_v19 = vmax.f32 %v768_v18, 0.0 }
 0x212   : > { %v796_v22 = vpop.f32.mrf.mxu1 }
 0x213   : > { %v797_v25 = vadd.f32 %v796_v22, %v3440_v23 }
 0x215   : > { %v837_v52 = vmax.f32 %v797_v25, 0.0  ;;  %v769_v37 = vpop.f32.mrf.mxu0 }
 0x216   : > { %v770_v39 = vadd.f32 %v769_v37, %v3308_v44 }
 0x218   : > { %v854_v40 = vmax.f32 %v770_v39, 0.0 }
 0x21a   : > { %v798_v26 = vpop.f32.mrf.mxu1  ;;  %v909_v45 = vpack.c.bf16 %v854_v40, %v852_v19 }
 0x21b   : > { %v799_v29 = vadd.f32 %v798_v26, %v3440_v23 }
 0x21c   : > { %1105 = vmatmul.bf16.gmra.mxu2 %v909_v45  ;;  %1203 = vmatmul.bf16.gmra.mxu0 %v909_v45 }
 0x21d   : > { %v839_v31 = vmax.f32 %v799_v29, 0.0  ;;  %v772_v47 = vpop.f32.mrf.mxu0 }
 0x21e   : > { %v773_v51 = vadd.f32 %v772_v47, %v3308_v44 }
 0x21f   : > { %v902_v32 = vpack.c.bf16 %v839_v31, %v837_v52 }
 0x220   : > { %v856_v58 = vmax.f32 %v773_v51, 0.0 }
 0x221   : > { %1134 = vmatmul.bf16.vlgmr.msra.gmra.mxu3 %v902_v32  ;;  %1232 = vmatmul.bf16.vlgmr.msra.gmra.mxu1 %v902_v32 }
 0x222   : > { %v801_v34 = vpop.f32.mrf.mxu1 }
 0x223   : > { %v802_v36 = vadd.f32 %v801_v34, %v3440_v23 }
 0x224   : > { %v1086_v51 = vpop.f32.mrf.mxu2 }
 0x225   : > { %v841_v42 = vmax.f32 %v802_v36, 0.0  ;;  %v774_v55 = vpop.f32.mrf.mxu0 }
 0x226   : > { %v775_v60 = vadd.f32 %v774_v55, %v3308_v44 }
 0x228   : > { %v858_v62 = vmax.f32 %v775_v60, 0.0 }
 0x22a   : > { %v803_v35 = vpop.f32.mrf.mxu1  ;;  %v911_v5 = vpack.c.bf16 %v858_v62, %v856_v58 }
 0x22b   : > { %v804_v33 = vadd.f32 %v803_v35, %v3440_v23 }
 0x22c   : > { %1110 = vmatmul.bf16.gmra.mxu2 %v911_v5  ;;  %1208 = vmatmul.bf16.gmra.mxu0 %v911_v5 }
 0x22d   : > { %v843_v43 = vmax.f32 %v804_v33, 0.0  ;;  %v777_v7 = vpop.f32.mrf.mxu0 }
 0x22e   : > { %v778_v10 = vadd.f32 %v777_v7, %v3308_v44 }
 0x22f   : > { %v904_v46 = vpack.c.bf16 %v843_v43, %v841_v42 }
 0x230   : > { %v860_v4 = vmax.f32 %v778_v10, 0.0 }
 0x231   : > { %1139 = vmatmul.bf16.gmra.mxu3 %v904_v46  ;;  %1237 = vmatmul.bf16.gmra.mxu1 %v904_v46 }
 0x232   : > { %v806_v49 = vpop.f32.mrf.mxu1 }
 0x233   : > { %v807_v54 = vadd.f32 %v806_v49, %v3440_v23 }
 0x235   : > { %v845_v63 = vmax.f32 %v807_v54, 0.0  ;;  %v779_v59 = vpop.f32.mrf.mxu0 }
 0x236   : > { %v780_v9 = vadd.f32 %v779_v59, %v3308_v44 }
 0x238   : > { %v862_v14 = vmax.f32 %v780_v9, 0.0 }
 0x23a   : > { %v808_v56 = vpop.f32.mrf.mxu1  ;;  %v913_v20 = vpack.c.bf16 %v862_v14, %v860_v4 }
 0x23b   : > { %v809_v61 = vadd.f32 %v808_v56, %v3440_v23 }
 0x23c   : > { %1115 = vmatmul.bf16.gmra.mxu2 %v913_v20  ;;  %1213 = vmatmul.bf16.gmra.mxu0 %v913_v20 }
 0x23d   : > { %v847_v2 = vmax.f32 %v809_v61, 0.0  ;;  %v782_v22 = vpop.f32.mrf.mxu0 }
 0x23e   : > { %v783_v25 = vadd.f32 %v782_v22, %v3308_v44 }
 0x23f   : > { %v906_v6 = vpack.c.bf16 %v847_v2, %v845_v63  ;;  %v3470_v63 = vpop.f32.mrf.mxu2 }
 0x240   : > { %v864_v28 = vmax.f32 %v783_v25, 0.0  ;;  %4009 = vst [vmem:[#allocation12_spill] sm:$0xff] %v3470_v63 }
 0x241   : > { %1144 = vmatmul.bf16.gmra.mxu3 %v906_v6  ;;  %1242 = vmatmul.bf16.gmra.mxu1 %v906_v6 }
 0x242   : > { %v811_v8 = vpop.f32.mrf.mxu1 }
 0x243   : > { %v812_v11 = vadd.f32 %v811_v8, %v3440_v23 }
 0x245   : > { %v849_v16 = vmax.f32 %v812_v11, 0.0  ;;  %v784_v26 = vpop.f32.mrf.mxu0 }
 0x246   : > { %v785_v29 = vadd.f32 %v784_v26, %v3308_v44 }
 0x247   : > { %v1091_v5 = vpop.f32.mrf.mxu2 }
 0x248   : > { %v866_v52 = vmax.f32 %v785_v29, 0.0 }
 0x24a   : > { %v813_v0 = vpop.f32.mrf.mxu1  ;;  %v915_v32 = vpack.c.bf16 %v866_v52, %v864_v28 }
 0x24b   : > { %v814_v13 = vadd.f32 %v813_v0, %v3440_v23 }
 0x24c   : > { %1120 = vmatmul.bf16.gmra.mxu2 %v915_v32  ;;  %1218 = vmatmul.bf16.gmra.mxu0 %v915_v32 }
 0x24d   : > { %v851_v17 = vmax.f32 %v814_v13, 0.0  ;;  %v1184_v47 = vpop.f32.mrf.mxu0 }
 0x24f   : > { %v908_v21 = vpack.c.bf16 %v851_v17, %v849_v16  ;;  %v3476_v11 = vpop.f32.mrf.mxu2 }
 0x251   : > { %1149 = vmatmul.bf16.gmra.mxu3 %v908_v21  ;;  %1247 = vmatmul.bf16.gmra.mxu1 %v908_v21 }
 0x252   : > { %v816_v24 = vpop.f32.mrf.mxu1 }
 0x253   : > { %v817_v15 = vadd.f32 %v816_v24, %v3440_v23 }
 0x255   : > { %v853_v31 = vmax.f32 %v817_v15, 0.0  ;;  %v3467_v56 = vpop.f32.mrf.mxu0 }
 0x257   : > { %v1096_v13 = vpop.f32.mrf.mxu2 }
 0x25a   : > { %v818_v27 = vpop.f32.mrf.mxu1 }
 0x25b   : > { %v819_v30 = vadd.f32 %v818_v27, %v3440_v23 }
 0x25d   : > { %v855_v53 = vmax.f32 %v819_v30, 0.0  ;;  %v1189_v2 = vpop.f32.mrf.mxu0 }
 0x25f   : > { %v910_v38 = vpack.c.bf16 %v855_v53, %v853_v31  ;;  %v3492_v22 = vpop.f32.mrf.mxu2 }
 0x261   : > { %1154 = vmatmul.bf16.gmra.mxu3 %v910_v38  ;;  %1252 = vmatmul.bf16.gmra.mxu1 %v910_v38 }
 0x262   : > { %v821_v34 = vpop.f32.mrf.mxu1 }
 0x263   : > { %v822_v18 = vadd.f32 %v821_v34, %v3440_v23 }
 0x265   : > { %v857_v35 = vmax.f32 %v822_v18, 0.0  ;;  %v3472_v7 = vpop.f32.mrf.mxu0 }
 0x26a   : > { %v823_v36 = vpop.f32.mrf.mxu1 }
 0x26b   : > { %v824_v37 = vadd.f32 %v823_v36, %v3440_v23 }
 0x26d   : > { %v859_v19 = vmax.f32 %v824_v37, 0.0  ;;  %v1194_v0 = vpop.f32.mrf.mxu0 }
 0x26f   : > { %v912_v44 = vpack.c.bf16 %v859_v19, %v857_v35 }
 0x271   : > { %1159 = vmatmul.bf16.gmra.mxu3 %v912_v44  ;;  %1257 = vmatmul.bf16.gmra.mxu1 %v912_v44 }
 0x272   : > { %v826_v39 = vpop.f32.mrf.mxu1 }
 0x273   : > { %v827_v33 = vadd.f32 %v826_v39, %v3440_v23 }
 0x275   : > { %v861_v43 = vmax.f32 %v827_v33, 0.0  ;;  %v3486_v16 = vpop.f32.mrf.mxu0 }
 0x27a   : > { %v828_v40 = vpop.f32.mrf.mxu1 }
 0x27b   : > { %v829_v42 = vadd.f32 %v828_v40, %v3440_v23 }
 0x27d   : > { %v863_v45 = vmax.f32 %v829_v42, 0.0 }
 0x27f   : > { %v914_v46 = vpack.c.bf16 %v863_v45, %v861_v43 }
 0x281   : > { %1164 = vmatmul.bf16.gmra.mxu3 %v914_v46  ;;  %1262 = vmatmul.bf16.gmra.mxu1 %v914_v46 }
 0x282   : > { %v831_v49 = vpop.f32.mrf.mxu1 }
 0x283   : > { %v832_v54 = vadd.f32 %v831_v49, %v3440_v23 }
 0x285   : > { %v865_v60 = vmax.f32 %v832_v54, 0.0 }
 0x289   : > { %v1199_v25 = vpop.f32.mrf.mxu0 }
 0x28a   : > { %v833_v55 = vpop.f32.mrf.mxu1 }
 0x28b   : > { %v834_v58 = vadd.f32 %v833_v55, %v3440_v23 }
 0x28d   : > { %v867_v61 = vmax.f32 %v834_v58, 0.0 }
 0x28f   : > { %v916_v62 = vpack.c.bf16 %v867_v61, %v865_v60  ;;  %v1101_v27 = vpop.f32.mrf.mxu2 }
 0x291   : > { %1169 = vmatmul.bf16.gmra.mxu3 %v916_v62  ;;  %1267 = vmatmul.bf16.gmra.mxu1 %v916_v62  ;;  %v3500_v30 = vpop.f32.mrf.mxu0 }
 0x297   : > { %v3504_v31 = vpop.f32.mrf.mxu2 }
 0x299   : > { %v1204_v34 = vpop.f32.mrf.mxu0 }
 0x29e   : > { %v1233_v6 = vpop.f32.mrf.mxu1 }
 0x29f   : > { %v3474_v8 = vadd.f32 %v1233_v6, %v1184_v47  ;;  %v1106_v37 = vpop.f32.mrf.mxu2 }
 0x2a1   : > { %4010 = vst [vmem:[#allocation13_spill] sm:$0xff] %v3474_v8  ;;  %v1206_v19 = vpop.f32.mrf.mxu0 }
 0x2a4   : > { %v1135_v10 = vpop.f32.mrf.mxu3 }
 0x2a5   : > { %v3478_v59 = vadd.f32 %v1135_v10, %v1086_v51 }
 0x2a6   : > { %v3480_v23 = vpop.f32.mrf.mxu1 }
 0x2a7   : > { %4011 = vst [vmem:[#allocation14_spill] sm:$0xff] %v3478_v59  ;;  %v1108_v40 = vpop.f32.mrf.mxu2 }
 0x2a9   : > { %v1209_v42 = vpop.f32.mrf.mxu0 }
 0x2ac   : > { %v3482_v4 = vpop.f32.mrf.mxu3 }
 0x2ad   : > { %4012 = vst [vmem:[#allocation15_spill] sm:$0xff] %v3482_v4 }
 0x2ae   : > { %v1238_v9 = vpop.f32.mrf.mxu1 }
 0x2af   : > { %v3484_v14 = vadd.f32 %v1238_v9, %v1189_v2  ;;  %v1111_v47 = vpop.f32.mrf.mxu2 }
 0x2b1   : > { %v1211_v51 = vpop.f32.mrf.mxu0 }
 0x2b4   : > { %v1140_v17 = vpop.f32.mrf.mxu3 }
 0x2b5   : > { %v3488_v20 = vadd.f32 %v1140_v17, %v1091_v5 }
 0x2b6   : > { %v3490_v21 = vpop.f32.mrf.mxu1 }
 0x2b7   : > { %4013 = vst [vmem:[#allocation16_spill] sm:$0xff] %v3488_v20  ;;  %v1113_v55 = vpop.f32.mrf.mxu2 }
 0x2b9   : > { %v1214_v61 = vpop.f32.mrf.mxu0 }
 0x2bc   : > { %v3494_v24 = vpop.f32.mrf.mxu3 }
 0x2be   : > { %v1243_v15 = vpop.f32.mrf.mxu1 }
 0x2bf   : > { %v3496_v26 = vadd.f32 %v1243_v15, %v1194_v0  ;;  %v1116_v2 = vpop.f32.mrf.mxu2 }
 0x2c1   : > { %v1216_v6 = vpop.f32.mrf.mxu0 }
 0x2c4   : > { %v1145_v28 = vpop.f32.mrf.mxu3 }
 0x2c5   : > { %v3498_v29 = vadd.f32 %v1145_v28, %v1096_v13 }
 0x2c6   : > { %v3502_v52 = vpop.f32.mrf.mxu1 }
 0x2c7   : > { %v1118_v9 = vpop.f32.mrf.mxu2 }
 0x2c9   : > { %v1219_v13 = vpop.f32.mrf.mxu0 }
 0x2cc   : > { %v3506_v53 = vpop.f32.mrf.mxu3 }
 0x2ce   : > { %v1248_v32 = vpop.f32.mrf.mxu1 }
 0x2cf   : > { %v3508_v38 = vadd.f32 %v1248_v32, %v1199_v25  ;;  %v1121_v15 = vpop.f32.mrf.mxu2 }
 0x2d1   : > { %v1221_v28 = vpop.f32.mrf.mxu0 }
 0x2d4   : > { %v1150_v18 = vpop.f32.mrf.mxu3 }
 0x2d5   : > { %v3510_v36 = vadd.f32 %v1150_v18, %v1101_v27 }
 0x2d6   : > { %v1250_v35 = vpop.f32.mrf.mxu1 }
 0x2d7   : > { %v1123_v50 = vpop.f32.mrf.mxu2 }
 0x2dc   : > { %v3512_v44 = vpop.f32.mrf.mxu3 }
 0x2de   : > { %v1253_v39 = vpop.f32.mrf.mxu1 }
 0x2df   : > { %v1254_v33 = vadd.f32 %v1253_v39, %v1204_v34 }
 0x2e4   : > { %v1155_v43 = vpop.f32.mrf.mxu3 }
 0x2e5   : > { %v1156_v45 = vadd.f32 %v1155_v43, %v1106_v37 }
 0x2e6   : > { %v1255_v46 = vpop.f32.mrf.mxu1 }
 0x2e7   : > { %v1256_v4 = vadd.f32 %v1255_v46, %v1206_v19 }
 0x2ec   : > { %v1157_v49 = vpop.f32.mrf.mxu3 }
 0x2ee   : > { %v1258_v54 = vpop.f32.mrf.mxu1 }
 0x2ef   : > { %v1259_v59 = vadd.f32 %v1258_v54, %v1209_v42  ;;  %v2705_v42 = vld [vmem:[%s3980_s2 + $0x2e4] sm:$0xf0]  ;;  %v2526_v54 = vld [vmem:[%s3980_s2 + $0x270] sm:$0xf] }
 0x2f4   : > { %v1160_v58 = vpop.f32.mrf.mxu3 }
 0x2f6   : > { %v1260_v60 = vpop.f32.mrf.mxu1 }
 0x2f7   : > { %v1261_v3 = vadd.f32 %v1260_v60, %v1211_v51  ;;  %v1158_v51 = vadd.f32 %v1157_v49, %v1108_v40  ;;  %v2582_v40 = vld [vmem:[%s3980_s2 + $0x2e0] sm:$0xf] }
 0x2f8   : > { %v2583_v46 = vor.u32 %v2705_v42, %v2582_v40  ;;  %v2544_v42 = vld [vmem:[%s3980_s2 + $0x298] sm:$0xf0] }
 0x2f9   : > { %v1284_v63 = vpack.c.bf16 %v1261_v3, %v1259_v59 }
 0x2fc   : > { %v1162_v62 = vpop.f32.mrf.mxu3 }
 0x2fe   : > { %v1263_v5 = vpop.f32.mrf.mxu1 }
 0x2ff   : > { %v1264_v43 = vadd.f32 %v1263_v5, %v1214_v61  ;;  %v1251_v61 = vadd.f32 %v1250_v35, %v3500_v30  ;;  %v1282_v5 = vpack.c.bf16 %v1256_v4, %v1254_v33  ;;  %v1143_v4 = vadd.f32 %v3494_v24, %v3476_v11  ;;  %v4017_v30 = vld [vmem:[#allocation16_spill] sm:$0xff]  ;;  %v4020_v11 = vld [vmem:[#allocation6_spill] sm:$0xff]  ;;  %v4021_v24 = vld [vmem:[#allocation7_spill] sm:$0xff] }
 0x300   : > { %v2706_v35 = vld [vmem:[%s3980_s2 + $0x2f4] sm:$0xf] }
 0x304   : > { %v1165_v10 = vpop.f32.mrf.mxu3 }
 0x305   : > { %v1166_v8 = vadd.f32 %v1165_v10, %v1116_v2  ;;  %v2528_v2 = vld [vmem:[%s3980_s2 + $0x278] sm:$0xf0]  ;;  %v2574_v10 = vld [vmem:[%s3980_s2 + $0x2d0] sm:$0xf] }
 0x306   : > { %v1265_v0 = vpop.f32.mrf.mxu1 }
 0x307   : > { %v1266_v37 = vadd.f32 %v1265_v0, %v1216_v6  ;;  %v1161_v6 = vadd.f32 %v1160_v58, %v1111_v47  ;;  %v2584_v47 = vld [vmem:[%s3980_s2 + $0x2e8] sm:$0xf0]  ;;  %v2690_v58 = vld [vmem:[%s3980_s2 + $0x274] sm:$0xf]  ;;  %v2703_v0 = vld [vmem:[%s3980_s2 + $0x2d4] sm:$0xf0] }
 0x309   : > { %v1286_v12 = vpack.c.bf16 %v1266_v37, %v1264_v43  ;;  %v2520_v37 = vld [vmem:[%s3980_s2 + $0x268] sm:$0xf0] }
 0x30c   : > { %v1167_v17 = vpop.f32.mrf.mxu3 }
 0x30d   : > { %v1168_v41 = vadd.f32 %v1167_v17, %v1118_v9  ;;  %v2531_v9 = vor.u32 %v2690_v58, %v2528_v2  ;;  %v2575_v17 = vor.u32 %v2703_v0, %v2574_v10  ;;  %v2693_v2 = vld [vmem:[%s3980_s2 + $0x284] sm:$0xf0]  ;;  %v2692_v10 = vld [vmem:[%s3980_s2 + $0x284] sm:$0xf] }
 0x30e   : > { %v1268_v25 = vpop.f32.mrf.mxu1 }
 0x30f   : > { %v1269_v34 = vadd.f32 %v1268_v25, %v1219_v13  ;;  %v1163_v13 = vadd.f32 %v1162_v62, %v1113_v55  ;;  %v1285_v25 = vpack.c.bf16 %v1168_v41, %v1166_v8  ;;  %v1241_v41 = vadd.f32 %v3490_v21, %v3472_v7  ;;  %v4015_v21 = vld [vmem:[#allocation12_spill] sm:$0xff] }
 0x310   : > { %v1236_v8 = vadd.f32 %v3480_v23, %v3467_v56  ;;  %v4018_v56 = vld [vmem:[#allocation5_spill] sm:$0xff]  ;;  %v4019_v23 = vld [vmem:[#allocation14_spill] sm:$0xff]  ;;  %v2691_v55 = vld [vmem:[%s3980_s2 + $0x274] sm:$0xf0] }
 0x311   : > { %v1283_v60 = vpack.c.bf16 %v1163_v13, %v1161_v6  ;;  %v1276_v59 = vpack.c.bf16 %v1241_v41, %v3484_v14  ;;  %v2527_v62 = vor.u32 %v2691_v55, %v2526_v54  ;;  %v2566_v13 = vld [vmem:[%s3980_s2 + $0x2c0] sm:$0xf]  ;;  %v2568_v6 = vld [vmem:[%s3980_s2 + $0x2c8] sm:$0xf0] }
 0x312   : > { %v2488_v55 = vld [vmem:[%s3980_s2 + $0x228] sm:$0xf0] }
 0x313   : > { %1635 = vmatpush.bf16.msrb.mxu0 %v2527_v62  ;;  %v2534_v62 = vld [vmem:[%s3980_s2 + $0x280] sm:$0xf] }
 0x314   : > { %v1170_v27 = vpop.f32.mrf.mxu3  ;;  %v2535_v0 = vor.u32 %v2693_v2, %v2534_v62 }
 0x315   : > { %v1171_v1 = vadd.f32 %v1170_v27, %v1121_v15  ;;  %v2702_v15 = vld [vmem:[%s3980_s2 + $0x2d4] sm:$0xf]  ;;  %v2576_v27 = vld [vmem:[%s3980_s2 + $0x2d8] sm:$0xf0] }
 0x316   : > { %v1270_v32 = vpop.f32.mrf.mxu1 }
 0x317   : > { %v1271_v18 = vadd.f32 %v1270_v32, %v1221_v28  ;;  %v2518_v28 = vld [vmem:[%s3980_s2 + $0x260] sm:$0xf]  ;;  %v2579_v32 = vor.u32 %v2702_v15, %v2576_v27  ;;  %v2478_v15 = vld [vmem:[%s3980_s2 + $0x210] sm:$0xf]  ;;  %v2679_v27 = vld [vmem:[%s3980_s2 + $0x214] sm:$0xf0] }
 0x319   : > { %v1288_v39 = vpack.c.bf16 %v1271_v18, %v1269_v34  ;;  %v2689_v34 = vld [vmem:[%s3980_s2 + $0x264] sm:$0xf0]  ;;  %v2688_v18 = vld [vmem:[%s3980_s2 + $0x264] sm:$0xf] }
 0x31a   : > { %v2523_v43 = vor.u32 %v2688_v18, %v2520_v37  ;;  %v3732_v18 = vld [vmem:[%s3184_s9 + $0x38] sm:$0xff] }
 0x31b   : > { %1345 = vmatpush.bf16.msrb.mxu3 %v1288_v39  ;;  %v2519_v39 = vor.u32 %v2689_v34, %v2518_v28  ;;  %v2678_v28 = vld [vmem:[%s3980_s2 + $0x214] sm:$0xf]  ;;  %v2480_v34 = vld [vmem:[%s3980_s2 + $0x218] sm:$0xf0] }
 0x31c   : > { %v1172_v57 = vpop.f32.mrf.mxu3  ;;  %v2483_v37 = vor.u32 %v2678_v28, %v2480_v34 }
 0x31d   : > { %v1173_v48 = vadd.f32 %v1172_v57, %v1123_v50  ;;  %v1246_v57 = vadd.f32 %v3502_v52, %v3486_v16  ;;  %v1148_v50 = vadd.f32 %v3506_v53, %v3492_v22  ;;  %v4014_v16 = vld [vmem:[#allocation13_spill] sm:$0xff]  ;;  %v4016_v22 = vld [vmem:[#allocation15_spill] sm:$0xff]  ;;  %v1275_v52 = vpack.c.bf16 %v1143_v4, %v4017_v30  ;;  %v4024_v53 = vld [vmem:[#allocation10_spill] sm:$0xff]  ;;  %1636 = vmatpush.bf16.msrb.mxu0 %v2519_v39 }
 0x31e   : > { %v2560_v4 = vld [vmem:[%s3980_s2 + $0x2b8] sm:$0xf0]  ;;  %4026 = vst [vmem:[#allocation13_spill] sm:$0xff] %v3732_v18  ;;  %v2470_v39 = vld [vmem:[%s3980_s2 + $0x200] sm:$0xf] }
 0x31f   : > { %v1287_v20 = vpack.c.bf16 %v1173_v48, %v1171_v1  ;;  %1346 = vmatpush.bf16.msrb.mxu3 %v1286_v12  ;;  %v1280_v48 = vpack.c.bf16 %v1251_v61, %v3508_v38  ;;  %v1153_v1 = vadd.f32 %v3512_v44, %v3504_v31  ;;  %v1281_v12 = vpack.c.bf16 %v1158_v51, %v1156_v45  ;;  %v4023_v31 = vld [vmem:[#allocation9_spill] sm:$0xff]  ;;  %v2590_v38 = vld [vmem:[%s3980_s2 + $0x2f0] sm:$0xf]  ;;  %v2592_v44 = vld [vmem:[%s3980_s2 + $0x2f8] sm:$0xf0] }
 0x320   : > { %v1278_v3 = vpack.c.bf16 %v1246_v57, %v3496_v26  ;;  %v1277_v7 = vpack.c.bf16 %v1148_v50, %v3498_v29  ;;  %v1138_v26 = vadd.f32 %v4016_v22, %v4015_v21  ;;  %v4022_v29 = vld [vmem:[#allocation8_spill] sm:$0xff]  ;;  %v2595_v33 = vor.u32 %v2706_v35, %v2592_v44  ;;  %v2704_v45 = vld [vmem:[%s3980_s2 + $0x2e4] sm:$0xf]  ;;  %v2510_v51 = vld [vmem:[%s3980_s2 + $0x250] sm:$0xf] }
 0x321   : > { %1296 = vmatpush.bf16.msrb.mxu2 %v1287_v20  ;;  %v1274_v20 = vpack.c.bf16 %v1236_v8, %v4014_v16  ;;  %v2587_v49 = vor.u32 %v2704_v45, %v2584_v47  ;;  %v2700_v61 = vld [vmem:[%s3980_s2 + $0x2c4] sm:$0xf]  ;;  %v2686_v57 = vld [vmem:[%s3980_s2 + $0x254] sm:$0xf]  ;;  %v2558_v50 = vld [vmem:[%s3980_s2 + $0x2b0] sm:$0xf] }
 0x322   : > { %v1273_v14 = vpack.c.bf16 %v1138_v26, %v4019_v23  ;;  %v2698_v8 = vld [vmem:[%s3980_s2 + $0x2b4] sm:$0xf]  ;;  %v2502_v16 = vld [vmem:[%s3980_s2 + $0x240] sm:$0xf]  ;;  %v2684_v21 = vld [vmem:[%s3980_s2 + $0x244] sm:$0xf] }
 0x323   : > { %1347 = vmatpush.bf16.msrb.mxu3 %v1284_v63  ;;  %v1279_v63 = vpack.c.bf16 %v1153_v1, %v3510_v36  ;;  %v2707_v36 = vld [vmem:[%s3980_s2 + $0x2f4] sm:$0xf0]  ;;  %v2571_v1 = vor.u32 %v2700_v61, %v2568_v6  ;;  %v2504_v26 = vld [vmem:[%s3980_s2 + $0x248] sm:$0xf0]  ;;  %v2696_v23 = vld [vmem:[%s3980_s2 + $0x2a4] sm:$0xf] }
 0x324   : > { %v2591_v19 = vor.u32 %v2707_v36, %v2590_v38  ;;  %v2507_v30 = vor.u32 %v2684_v21, %v2504_v26  ;;  %v2682_v38 = vld [vmem:[%s3980_s2 + $0x234] sm:$0xf]  ;;  %v2496_v36 = vld [vmem:[%s3980_s2 + $0x238] sm:$0xf0]  ;;  %v2695_v44 = vld [vmem:[%s3980_s2 + $0x294] sm:$0xf0] }
 0x325   : > { %1297 = vmatpush.bf16.msrb.mxu2 %v1285_v25  ;;  %v2701_v25 = vld [vmem:[%s3980_s2 + $0x2c4] sm:$0xf0]  ;;  %v2499_v35 = vor.u32 %v2682_v38, %v2496_v36  ;;  %v2472_v61 = vld [vmem:[%s3980_s2 + $0x208] sm:$0xf0]  ;;  %v2435_v6 = vld [vmem:[%s3981_s3 + $0x2] sm:$0x3] }
 0x326   : > { %1684 = vmatpush.bf16.msrb.mxu1 %v2591_v19  ;;  %v2542_v19 = vld [vmem:[%s3980_s2 + $0x290] sm:$0xf]  ;;  %v2681_v47 = vld [vmem:[%s3980_s2 + $0x224] sm:$0xf0] }
 0x327   : > { %1348 = vmatpush.bf16.msrb.mxu3 %v1282_v5  ;;  %v2567_v5 = vor.u32 %v2701_v25, %v2566_v13  ;;  %v2543_v40 = vor.u32 %v2695_v44, %v2542_v19  ;;  %v2676_v13 = vld [vmem:[%s3980_s2 + $0x204] sm:$0xf] }
 0x329   : > { %1298 = vmatpush.bf16.msrb.mxu2 %v1283_v60  ;;  %v2687_v60 = vld [vmem:[%s3980_s2 + $0x254] sm:$0xf0] }
 0x32a   : > { %1685 = vmatpush.bf16.msrb.mxu1 %v2583_v46  ;;  %v2486_v46 = vld [vmem:[%s3980_s2 + $0x220] sm:$0xf] }
 0x32b   : > { %1349 = vmatpush.bf16.msrb.mxu3 %v1280_v48  ;;  %v2512_v48 = vld [vmem:[%s3980_s2 + $0x258] sm:$0xf0]  ;;  %v2487_v54 = vor.u32 %v2681_v47, %v2486_v46 }
 0x32c   : > { %v2515_v41 = vor.u32 %v2686_v57, %v2512_v48 }
 0x32d   : > { %1299 = vmatpush.bf16.msrb.mxu2 %v1281_v12  ;;  %v2511_v12 = vor.u32 %v2687_v60, %v2510_v51  ;;  %v3751_v60 = vperm.slane %v2435_v6, 1 }
 0x32e   : > { %1686 = vmatpush.bf16.msrb.mxu1 %v2575_v17 }
 0x32f   : > { %1350 = vmatpush.bf16.msrb.mxu3 %v1278_v3  ;;  %v4025_v3 = vld [vmem:[#allocation11_spill] sm:$0xff]  ;;  %1637 = vmatpush.bf16.msrb.mxu0 %v2511_v12  ;;  %v3754_v12 = vperm.slane %v2435_v6, 0 }
 0x331   : > { %1300 = vmatpush.bf16.msrb.mxu2 %v1279_v63  ;;  %v2699_v63 = vld [vmem:[%s3980_s2 + $0x2b4] sm:$0xf0] }
 0x332   : > { %1687 = vmatpush.bf16.msrb.mxu1 %v2567_v5  ;;  %v2475_v5 = vor.u32 %v2676_v13, %v2472_v61 }
 0x333   : > { %1351 = vmatpush.bf16.msrb.mxu3 %v1276_v59  ;;  %v2559_v59 = vor.u32 %v2699_v63, %v2558_v50 }
 0x335   : > { %1301 = vmatpush.bf16.msrb.mxu2 %v1277_v7  ;;  %v2563_v7 = vor.u32 %v2698_v8, %v2560_v4 }
 0x336   : > { %1688 = vmatpush.bf16.msrb.mxu1 %v2559_v59 }
 0x337   : > { %1352 = vmatpush.bf16.msrb.mxu3 %v1274_v20  ;;  %v2685_v20 = vld [vmem:[%s3980_s2 + $0x244] sm:$0xf0] }
 0x338   : > { %v2503_v22 = vor.u32 %v2685_v20, %v2502_v16 }
 0x339   : > { %1302 = vmatpush.bf16.msrb.mxu2 %v1275_v52  ;;  %v2550_v52 = vld [vmem:[%s3980_s2 + $0x2a0] sm:$0xf] }
 0x33a   : > { %1353 = vmatmul.bf16.vlgmr.msrb.gmra.mxu3 %v4018_v56  ;;  %1638 = vmatpush.bf16.msrb.mxu0 %v2503_v22 }
 0x33b   : > { %1782 = vmatpush.bf16.msra.mxu3 %v2595_v33  ;;  %v2694_v33 = vld [vmem:[%s3980_s2 + $0x294] sm:$0xf] }
 0x33c   : > { %v2547_v45 = vor.u32 %v2694_v33, %v2544_v42 }
 0x33d   : > { %1303 = vmatpush.bf16.msrb.mxu2 %v1273_v14 }
 0x33f   : > { %1783 = vmatpush.bf16.msra.mxu3 %v2587_v49  ;;  %v2680_v49 = vld [vmem:[%s3980_s2 + $0x224] sm:$0xf] }
 0x340   : > { %1304 = vmatmul.bf16.vlgmr.msrb.gmra.mxu2 %v4018_v56  ;;  %v2697_v56 = vld [vmem:[%s3980_s2 + $0x2a4] sm:$0xf0]  ;;  %v2491_v58 = vor.u32 %v2680_v49, %v2488_v55 }
 0x341   : > { %1733 = vmatpush.bf16.msra.mxu2 %v2531_v9  ;;  %v2551_v14 = vor.u32 %v2697_v56, %v2550_v52  ;;  %v2536_v9 = vld [vmem:[%s3980_s2 + $0x288] sm:$0xf0] }
 0x342   : > { %v2539_v17 = vor.u32 %v2692_v10, %v2536_v9 }
 0x343   : > { %1784 = vmatpush.bf16.msra.mxu3 %v2579_v32  ;;  %1689 = vmatpush.bf16.msrb.mxu1 %v2551_v14  ;;  %v2479_v32 = vor.u32 %v2679_v27, %v2478_v15 }
 0x345   : > { %1734 = vmatpush.bf16.msra.mxu2 %v2523_v43  ;;  %v2677_v43 = vld [vmem:[%s3980_s2 + $0x204] sm:$0xf0] }
 0x346   : > { %v2471_v25 = vor.u32 %v2677_v43, %v2470_v39 }
 0x347   : > { %1785 = vmatpush.bf16.msra.mxu3 %v2571_v1  ;;  %1690 = vmatpush.bf16.msrb.mxu1 %v2543_v40 }
 0x349   : > { %1735 = vmatpush.bf16.msra.mxu2 %v2515_v41 }
 0x34a   : > { %1358 = vmatmul.bf16.gmra.mxu3 %v4020_v11 }
 0x34b   : > { %1786 = vmatpush.bf16.msra.mxu3 %v2563_v7  ;;  %1691 = vmatpush.bf16.msrb.mxu1 %v2535_v0 }
 0x34d   : > { %1736 = vmatpush.bf16.msra.mxu2 %v2507_v30 }
 0x350   : > { %1309 = vmatmul.bf16.gmra.mxu2 %v4020_v11  ;;  %v2552_v11 = vld [vmem:[%s3980_s2 + $0x2a8] sm:$0xf0] }
 0x351   : > { %1737 = vmatpush.bf16.msra.mxu2 %v2499_v35 }
 0x355   : > { %1738 = vmatpush.bf16.msra.mxu2 %v2491_v58 }
 0x359   : > { %1739 = vmatpush.bf16.msra.mxu2 %v2483_v37 }
 0x35a   : > { %1363 = vmatmul.bf16.gmra.mxu3 %v4021_v24 }
 0x35d   : > { %1740 = vmatpush.bf16.msra.mxu2 %v2475_v5 }
 0x360   : > { %1314 = vmatmul.bf16.gmra.mxu2 %v4021_v24  ;;  %v2555_v24 = vor.u32 %v2696_v23, %v2552_v11 }
 0x362   : > { %1787 = vmatpush.bf16.msra.mxu3 %v2555_v24 }
 0x366   : > { %1788 = vmatpush.bf16.msra.mxu3 %v2547_v45 }
 0x36a   : > { %1368 = vmatmul.bf16.gmra.mxu3 %v4022_v29 }
 0x36b   : > { %1789 = vmatpush.bf16.msra.mxu3 %v2539_v17 }
 0x370   : > { %1319 = vmatmul.bf16.gmra.mxu2 %v4022_v29  ;;  %v2494_v29 = vld [vmem:[%s3980_s2 + $0x230] sm:$0xf] }
 0x37a   : > { %1373 = vmatmul.bf16.gmra.mxu3 %v4023_v31 }
 0x380   : > { %1324 = vmatmul.bf16.gmra.mxu2 %v4023_v31  ;;  %v2683_v31 = vld [vmem:[%s3980_s2 + $0x234] sm:$0xf0] }
 0x38a   : > { %1378 = vmatmul.bf16.gmra.mxu3 %v4024_v53 }
 0x390   : > { %1329 = vmatmul.bf16.gmra.mxu2 %v4024_v53  ;;  %v2495_v53 = vor.u32 %v2683_v31, %v2494_v29 }
 0x392   : > { %1639 = vmatpush.bf16.msrb.mxu0 %v2495_v53 }
 0x396   : > { %1640 = vmatpush.bf16.msrb.mxu0 %v2487_v54 }
 0x39a   : > { %1383 = vmatmul.bf16.gmra.mxu3 %v4025_v3  ;;  %1641 = vmatpush.bf16.msrb.mxu0 %v2479_v32 }
 0x39e   : > { %1642 = vmatpush.bf16.msrb.mxu0 %v2471_v25 }
 0x3a0   : > { %1334 = vmatmul.bf16.gmra.mxu2 %v4025_v3 }
 0x3aa   : > { %1388 = vmatmul.bf16.gmra.mxu3 %v3732_v18 }
 0x3b0   : > { %1339 = vmatmul.bf16.gmra.mxu2 %v3732_v18 }
 0x3bd   : > { %v1354_v51 = vpop.f32.mrf.mxu3 }
 0x3be   : > { %v1355_v48 = vadd.f32 %v1354_v51, %v3751_v60 }
 0x3c0   : > { %v1395_v3 = vmax.f32 %v1355_v48, 0.0 }
 0x3c3   : > { %v1305_v57 = vpop.f32.mrf.mxu2 }
 0x3c4   : > { %v1306_v63 = vadd.f32 %v1305_v57, %v3754_v12 }
 0x3c5   : > { %v1356_v1 = vpop.f32.mrf.mxu3 }
 0x3c6   : > { %v1357_v41 = vadd.f32 %v1356_v1, %v3751_v60  ;;  %v1394_v16 = vmax.f32 %v1306_v63, 0.0 }
 0x3c8   : > { %v1397_v50 = vmax.f32 %v1357_v41, 0.0 }
 0x3ca   : > { %v1460_v8 = vpack.c.bf16 %v1397_v50, %v1395_v3 }
 0x3cb   : > { %v1307_v59 = vpop.f32.mrf.mxu2 }
 0x3cc   : > { %v1308_v4 = vadd.f32 %v1307_v59, %v3754_v12  ;;  %1692 = vmatmul.bf16.vlgmr.msrb.gmra.mxu1 %v1460_v8  ;;  %1790 = vmatmul.bf16.vlgmr.msra.gmra.mxu3 %v1460_v8 }
 0x3cd   : > { %v1359_v7 = vpop.f32.mrf.mxu3 }
 0x3ce   : > { %v1396_v20 = vmax.f32 %v1308_v4, 0.0  ;;  %v1360_v26 = vadd.f32 %v1359_v7, %v3751_v60 }
 0x3d0   : > { %v1459_v21 = vpack.c.bf16 %v1396_v20, %v1394_v16  ;;  %v1399_v56 = vmax.f32 %v1360_v26, 0.0 }
 0x3d2   : > { %1643 = vmatmul.bf16.vlgmr.msrb.gmra.mxu0 %v1459_v21  ;;  %1741 = vmatmul.bf16.vlgmr.msra.gmra.mxu2 %v1459_v21 }
 0x3d3   : > { %v1310_v22 = vpop.f32.mrf.mxu2 }
 0x3d4   : > { %v1311_v14 = vadd.f32 %v1310_v22, %v3754_v12 }
 0x3d5   : > { %v1361_v30 = vpop.f32.mrf.mxu3 }
 0x3d6   : > { %v1362_v52 = vadd.f32 %v1361_v30, %v3751_v60  ;;  %v1398_v53 = vmax.f32 %v1311_v14, 0.0 }
 0x3d8   : > { %v1401_v23 = vmax.f32 %v1362_v52, 0.0 }
 0x3da   : > { %v1462_v11 = vpack.c.bf16 %v1401_v23, %v1399_v56 }
 0x3db   : > { %v1312_v24 = vpop.f32.mrf.mxu2 }
 0x3dc   : > { %v1313_v29 = vadd.f32 %v1312_v24, %v3754_v12  ;;  %1697 = vmatmul.bf16.gmra.mxu1 %v1462_v11  ;;  %1795 = vmatmul.bf16.gmra.mxu3 %v1462_v11 }
 0x3dd   : > { %v1364_v31 = vpop.f32.mrf.mxu3 }
 0x3de   : > { %v1400_v38 = vmax.f32 %v1313_v29, 0.0  ;;  %v1365_v19 = vadd.f32 %v1364_v31, %v3751_v60 }
 0x3e0   : > { %v1461_v36 = vpack.c.bf16 %v1400_v38, %v1398_v53  ;;  %v1403_v40 = vmax.f32 %v1365_v19, 0.0 }
 0x3e2   : > { %1648 = vmatmul.bf16.gmra.mxu0 %v1461_v36  ;;  %1746 = vmatmul.bf16.gmra.mxu2 %v1461_v36 }
 0x3e3   : > { %v1315_v35 = vpop.f32.mrf.mxu2 }
 0x3e4   : > { %v1316_v45 = vadd.f32 %v1315_v35, %v3754_v12 }
 0x3e5   : > { %v1366_v44 = vpop.f32.mrf.mxu3 }
 0x3e6   : > { %v1367_v33 = vadd.f32 %v1366_v44, %v3751_v60  ;;  %v1402_v55 = vmax.f32 %v1316_v45, 0.0 }
 0x3e8   : > { %v1405_v42 = vmax.f32 %v1367_v33, 0.0 }
 0x3ea   : > { %v1464_v46 = vpack.c.bf16 %v1405_v42, %v1403_v40 }
 0x3eb   : > { %v1317_v47 = vpop.f32.mrf.mxu2 }
 0x3ec   : > { %v1318_v49 = vadd.f32 %v1317_v47, %v3754_v12  ;;  %1702 = vmatmul.bf16.gmra.mxu1 %v1464_v46  ;;  %1800 = vmatmul.bf16.gmra.mxu3 %v1464_v46 }
 0x3ed   : > { %v1369_v54 = vpop.f32.mrf.mxu3 }
 0x3ee   : > { %v1404_v58 = vmax.f32 %v1318_v49, 0.0  ;;  %v1370_v10 = vadd.f32 %v1369_v54, %v3751_v60 }
 0x3f0   : > { %v1463_v62 = vpack.c.bf16 %v1404_v58, %v1402_v55  ;;  %v1407_v17 = vmax.f32 %v1370_v10, 0.0 }
 0x3f2   : > { %1653 = vmatmul.bf16.gmra.mxu0 %v1463_v62  ;;  %1751 = vmatmul.bf16.gmra.mxu2 %v1463_v62 }
 0x3f3   : > { %v1320_v2 = vpop.f32.mrf.mxu2 }
 0x3f4   : > { %v1321_v27 = vadd.f32 %v1320_v2, %v3754_v12 }
 0x3f5   : > { %v1371_v0 = vpop.f32.mrf.mxu3 }
 0x3f6   : > { %v1372_v9 = vadd.f32 %v1371_v0, %v3751_v60  ;;  %v1406_v39 = vmax.f32 %v1321_v27, 0.0 }
 0x3f8   : > { %v1409_v15 = vmax.f32 %v1372_v9, 0.0 }
 0x3fa   : > { %v1466_v28 = vpack.c.bf16 %v1409_v15, %v1407_v17 }
 0x3fb   : > { %v1322_v32 = vpop.f32.mrf.mxu2 }
 0x3fc   : > { %v1323_v34 = vadd.f32 %v1322_v32, %v3754_v12  ;;  %1707 = vmatmul.bf16.gmra.mxu1 %v1466_v28  ;;  %1805 = vmatmul.bf16.gmra.mxu3 %v1466_v28 }
 0x3fd   : > { %v1374_v37 = vpop.f32.mrf.mxu3 }
 0x3fe   : > { %v1408_v43 = vmax.f32 %v1323_v34, 0.0  ;;  %v1375_v61 = vadd.f32 %v1374_v37, %v3751_v60 }
 0x400   : > { %v1465_v13 = vpack.c.bf16 %v1408_v43, %v1406_v39  ;;  %v1411_v51 = vmax.f32 %v1375_v61, 0.0 }
 0x402   : > { %1658 = vmatmul.bf16.gmra.mxu0 %v1465_v13  ;;  %1756 = vmatmul.bf16.gmra.mxu2 %v1465_v13 }
 0x403   : > { %v1325_v25 = vpop.f32.mrf.mxu2 }
 0x404   : > { %v1326_v48 = vadd.f32 %v1325_v25, %v3754_v12 }
 0x405   : > { %v1376_v5 = vpop.f32.mrf.mxu3 }
 0x406   : > { %v1377_v6 = vadd.f32 %v1376_v5, %v3751_v60  ;;  %v1410_v63 = vmax.f32 %v1326_v48, 0.0 }
 0x408   : > { %v1413_v57 = vmax.f32 %v1377_v6, 0.0 }
 0x40a   : > { %v1468_v1 = vpack.c.bf16 %v1413_v57, %v1411_v51 }
 0x40b   : > { %v1327_v41 = vpop.f32.mrf.mxu2 }
 0x40c   : > { %v1328_v3 = vadd.f32 %v1327_v41, %v3754_v12  ;;  %1712 = vmatmul.bf16.gmra.mxu1 %v1468_v1  ;;  %1810 = vmatmul.bf16.gmra.mxu3 %v1468_v1 }
 0x40d   : > { %v1379_v50 = vpop.f32.mrf.mxu3 }
 0x40e   : > { %v1412_v8 = vmax.f32 %v1328_v3, 0.0  ;;  %v1380_v7 = vadd.f32 %v1379_v50, %v3751_v60 }
 0x410   : > { %v1467_v59 = vpack.c.bf16 %v1412_v8, %v1410_v63  ;;  %v1415_v21 = vmax.f32 %v1380_v7, 0.0 }
 0x412   : > { %1663 = vmatmul.bf16.gmra.mxu0 %v1467_v59  ;;  %1761 = vmatmul.bf16.gmra.mxu2 %v1467_v59 }
 0x413   : > { %v1330_v4 = vpop.f32.mrf.mxu2 }
 0x414   : > { %v1331_v26 = vadd.f32 %v1330_v4, %v3754_v12 }
 0x415   : > { %v1381_v16 = vpop.f32.mrf.mxu3 }
 0x416   : > { %v1382_v20 = vadd.f32 %v1381_v16, %v3751_v60  ;;  %v1414_v14 = vmax.f32 %v1331_v26, 0.0 }
 0x418   : > { %v1417_v22 = vmax.f32 %v1382_v20, 0.0 }
 0x41a   : > { %v1470_v30 = vpack.c.bf16 %v1417_v22, %v1415_v21 }
 0x41b   : > { %v1332_v52 = vpop.f32.mrf.mxu2 }
 0x41c   : > { %v1333_v56 = vadd.f32 %v1332_v52, %v3754_v12  ;;  %1717 = vmatmul.bf16.gmra.mxu1 %v1470_v30  ;;  %1815 = vmatmul.bf16.gmra.mxu3 %v1470_v30 }
 0x41d   : > { %v1384_v23 = vpop.f32.mrf.mxu3 }
 0x41e   : > { %v1416_v11 = vmax.f32 %v1333_v56, 0.0  ;;  %v1385_v31 = vadd.f32 %v1384_v23, %v3751_v60 }
 0x420   : > { %v1469_v24 = vpack.c.bf16 %v1416_v11, %v1414_v14  ;;  %v1419_v36 = vmax.f32 %v1385_v31, 0.0 }
 0x422   : > { %1668 = vmatmul.bf16.gmra.mxu0 %v1469_v24  ;;  %1766 = vmatmul.bf16.gmra.mxu2 %v1469_v24 }
 0x423   : > { %v1335_v29 = vpop.f32.mrf.mxu2 }
 0x424   : > { %v1336_v19 = vadd.f32 %v1335_v29, %v3754_v12 }
 0x425   : > { %v1386_v53 = vpop.f32.mrf.mxu3 }
 0x426   : > { %v1387_v38 = vadd.f32 %v1386_v53, %v3751_v60  ;;  %v1418_v45 = vmax.f32 %v1336_v19, 0.0 }
 0x428   : > { %v1421_v35 = vmax.f32 %v1387_v38, 0.0 }
 0x42a   : > { %v1472_v44 = vpack.c.bf16 %v1421_v35, %v1419_v36 }
 0x42b   : > { %v1337_v33 = vpop.f32.mrf.mxu2 }
 0x42c   : > { %v1338_v40 = vadd.f32 %v1337_v33, %v3754_v12  ;;  %1722 = vmatmul.bf16.gmra.mxu1 %v1472_v44  ;;  %1820 = vmatmul.bf16.gmra.mxu3 %v1472_v44 }
 0x42d   : > { %v1389_v42 = vpop.f32.mrf.mxu3 }
 0x42e   : > { %v1420_v46 = vmax.f32 %v1338_v40, 0.0  ;;  %v1390_v54 = vadd.f32 %v1389_v42, %v3751_v60 }
 0x430   : > { %v1471_v47 = vpack.c.bf16 %v1420_v46, %v1418_v45  ;;  %v1423_v62 = vmax.f32 %v1390_v54, 0.0 }
 0x432   : > { %1673 = vmatmul.bf16.gmra.mxu0 %v1471_v47  ;;  %1771 = vmatmul.bf16.gmra.mxu2 %v1471_v47 }
 0x433   : > { %v1340_v49 = vpop.f32.mrf.mxu2 }
 0x434   : > { %v1341_v10 = vadd.f32 %v1340_v49, %v3754_v12 }
 0x435   : > { %v1391_v55 = vpop.f32.mrf.mxu3 }
 0x436   : > { %v1392_v58 = vadd.f32 %v1391_v55, %v3751_v60  ;;  %v1422_v15 = vmax.f32 %v1341_v10, 0.0 }
 0x438   : > { %v1425_v2 = vmax.f32 %v1392_v58, 0.0 }
 0x43a   : > { %v1474_v0 = vpack.c.bf16 %v1425_v2, %v1423_v62 }
 0x43b   : > { %v1342_v9 = vpop.f32.mrf.mxu2 }
 0x43c   : > { %v1343_v17 = vadd.f32 %v1342_v9, %v3754_v12  ;;  %1727 = vmatmul.bf16.gmra.mxu1 %v1474_v0  ;;  %1825 = vmatmul.bf16.gmra.mxu3 %v1474_v0 }
 0x43e   : > { %v1424_v27 = vmax.f32 %v1343_v17, 0.0 }
 0x440   : > { %v1473_v28 = vpack.c.bf16 %v1424_v27, %v1422_v15 }
 0x442   : > { %1678 = vmatmul.bf16.gmra.mxu0 %v1473_v28  ;;  %1776 = vmatmul.bf16.gmra.mxu2 %v1473_v28 }
 0x449   : > { %v1693_v32 = vpop.f32.mrf.mxu1 }
 0x44f   : > { %v1644_v34 = vpop.f32.mrf.mxu0  ;;  %v1791_v37 = vpop.f32.mrf.mxu3 }
 0x450   : > { %v3787_v39 = vadd.f32 %v1693_v32, %v1644_v34 }
 0x451   : > { %v3789_v60 = vpop.f32.mrf.mxu1 }
 0x455   : > { %v1742_v43 = vpop.f32.mrf.mxu2 }
 0x456   : > { %v3791_v13 = vadd.f32 %v1791_v37, %v1742_v43 }
 0x457   : > { %v3793_v25 = vpop.f32.mrf.mxu0  ;;  %v1793_v12 = vpop.f32.mrf.mxu3 }
 0x458   : > { %4027 = vst [vmem:[#allocation12_spill] sm:$0xff] %v3791_v13 }
 0x459   : > { %v1698_v61 = vpop.f32.mrf.mxu1 }
 0x45d   : > { %v1744_v5 = vpop.f32.mrf.mxu2 }
 0x45e   : > { %v3795_v6 = vadd.f32 %v1793_v12, %v1744_v5 }
 0x45f   : > { %v1649_v51 = vpop.f32.mrf.mxu0  ;;  %v1796_v57 = vpop.f32.mrf.mxu3 }
 0x460   : > { %v3799_v1 = vadd.f32 %v1698_v61, %v1649_v51 }
 0x461   : > { %v3801_v41 = vpop.f32.mrf.mxu1 }
 0x465   : > { %v1747_v3 = vpop.f32.mrf.mxu2 }
 0x466   : > { %v3803_v50 = vadd.f32 %v1796_v57, %v1747_v3 }
 0x467   : > { %v3805_v63 = vpop.f32.mrf.mxu0  ;;  %v1798_v8 = vpop.f32.mrf.mxu3 }
 0x469   : > { %v1703_v59 = vpop.f32.mrf.mxu1 }
 0x46d   : > { %v1749_v4 = vpop.f32.mrf.mxu2 }
 0x46e   : > { %v3807_v7 = vadd.f32 %v1798_v8, %v1749_v4 }
 0x46f   : > { %v1654_v16 = vpop.f32.mrf.mxu0  ;;  %v1801_v20 = vpop.f32.mrf.mxu3 }
 0x470   : > { %v3811_v22 = vadd.f32 %v1703_v59, %v1654_v16 }
 0x471   : > { %v3813_v26 = vpop.f32.mrf.mxu1 }
 0x475   : > { %v1752_v30 = vpop.f32.mrf.mxu2 }
 0x476   : > { %v3815_v52 = vadd.f32 %v1801_v20, %v1752_v30 }
 0x477   : > { %v3817_v56 = vpop.f32.mrf.mxu0  ;;  %v1803_v23 = vpop.f32.mrf.mxu3 }
 0x479   : > { %v1708_v14 = vpop.f32.mrf.mxu1 }
 0x47d   : > { %v1754_v11 = vpop.f32.mrf.mxu2 }
 0x47e   : > { %v3819_v24 = vadd.f32 %v1803_v23, %v1754_v11 }
 0x47f   : > { %v1659_v29 = vpop.f32.mrf.mxu0  ;;  %v1806_v31 = vpop.f32.mrf.mxu3 }
 0x480   : > { %v3823_v38 = vadd.f32 %v1708_v14, %v1659_v29 }
 0x481   : > { %v3825_v36 = vpop.f32.mrf.mxu1 }
 0x485   : > { %v1757_v35 = vpop.f32.mrf.mxu2 }
 0x486   : > { %v3827_v19 = vadd.f32 %v1806_v31, %v1757_v35 }
 0x487   : > { %v1661_v44 = vpop.f32.mrf.mxu0  ;;  %v1808_v33 = vpop.f32.mrf.mxu3 }
 0x489   : > { %v1713_v40 = vpop.f32.mrf.mxu1 }
 0x48d   : > { %v1759_v42 = vpop.f32.mrf.mxu2 }
 0x48e   : > { %v3829_v45 = vadd.f32 %v1808_v33, %v1759_v42 }
 0x48f   : > { %v1664_v46 = vpop.f32.mrf.mxu0  ;;  %v1811_v47 = vpop.f32.mrf.mxu3 }
 0x490   : > { %v1714_v54 = vadd.f32 %v1713_v40, %v1664_v46 }
 0x491   : > { %v1715_v55 = vpop.f32.mrf.mxu1 }
 0x495   : > { %v1762_v58 = vpop.f32.mrf.mxu2 }
 0x496   : > { %v3833_v62 = vadd.f32 %v1811_v47, %v1762_v58 }
 0x497   : > { %v1666_v2 = vpop.f32.mrf.mxu0  ;;  %v1813_v10 = vpop.f32.mrf.mxu3 }
 0x498   : > { %v1716_v49 = vadd.f32 %v1715_v55, %v1666_v2 }
 0x499   : > { %v1718_v0 = vpop.f32.mrf.mxu1 }
 0x49d   : > { %v1764_v9 = vpop.f32.mrf.mxu2 }
 0x49f   : > { %v1669_v17 = vpop.f32.mrf.mxu0  ;;  %v1816_v15 = vpop.f32.mrf.mxu3 }
 0x4a0   : > { %v1719_v48 = vadd.f32 %v1718_v0, %v1669_v17  ;;  %v1706_v0 = vadd.f32 %v3813_v26, %v3817_v56  ;;  %v4028_v56 = vpack.c.bf16 %v3829_v45, %v3827_v19 }
 0x4a1   : > { %v1720_v27 = vpop.f32.mrf.mxu1 }
 0x4a5   : > { %v1767_v28 = vpop.f32.mrf.mxu2 }
 0x4a7   : > { %v1671_v32 = vpop.f32.mrf.mxu0  ;;  %v1818_v34 = vpop.f32.mrf.mxu3 }
 0x4a8   : > { %v1721_v42 = vadd.f32 %v1720_v27, %v1671_v32  ;;  %v1814_v27 = vadd.f32 %v1813_v10, %v1764_v9 }
 0x4a9   : > { %v1723_v37 = vpop.f32.mrf.mxu1 }
 0x4aa   : > { %v1841_v18 = vpack.c.bf16 %v1721_v42, %v1719_v48  ;;  %v1840_v48 = vpack.c.bf16 %v1814_v27, %v3833_v62 }
 0x4ad   : > { %v1769_v43 = vpop.f32.mrf.mxu2 }
 0x4af   : > { %v1674_v12 = vpop.f32.mrf.mxu0  ;;  %v1821_v61 = vpop.f32.mrf.mxu3 }
 0x4b0   : > { %v1724_v35 = vadd.f32 %v1723_v37, %v1674_v12  ;;  %v1711_v37 = vadd.f32 %v3825_v36, %v1661_v44  ;;  %v1839_v12 = vpack.c.bf16 %v1716_v49, %v1714_v54 }
 0x4b1   : > { %v1725_v5 = vpop.f32.mrf.mxu1 }
 0x4b2   : > { %v1837_v17 = vpack.c.bf16 %v1711_v37, %v3823_v38  ;;  %v2596_v38 = vld [vmem:[%s3981_s3 + $0x4] sm:$0x3] }
 0x4b3   : > { %v3872_v36 = vperm.slane %v2596_v38, 0  ;;  %v3877_v49 = vperm.slane %v2596_v38, 1 }
 0x4b5   : > { %v1772_v51 = vpop.f32.mrf.mxu2 }
 0x4b6   : > { %v1822_v13 = vadd.f32 %v1821_v61, %v1772_v51 }
 0x4b7   : > { %v1676_v57 = vpop.f32.mrf.mxu0  ;;  %v1823_v3 = vpop.f32.mrf.mxu3 }
 0x4b8   : > { %v1726_v29 = vadd.f32 %v1725_v5, %v1676_v57  ;;  %v1817_v5 = vadd.f32 %v1816_v15, %v1767_v28 }
 0x4b9   : > { %v1728_v8 = vpop.f32.mrf.mxu1 }
 0x4ba   : > { %v1843_v46 = vpack.c.bf16 %v1726_v29, %v1724_v35 }
 0x4bd   : > { %v1774_v59 = vpop.f32.mrf.mxu2 }
 0x4be   : > { %v1824_v21 = vadd.f32 %v1823_v3, %v1774_v59 }
 0x4bf   : > { %v1679_v4 = vpop.f32.mrf.mxu0  ;;  %v1826_v16 = vpop.f32.mrf.mxu3 }
 0x4c0   : > { %v1729_v14 = vadd.f32 %v1728_v8, %v1679_v4  ;;  %v1819_v8 = vadd.f32 %v1818_v34, %v1769_v43  ;;  %v1844_v4 = vpack.c.bf16 %v1824_v21, %v1822_v13  ;;  %v1835_v13 = vpack.c.bf16 %v1706_v0, %v3811_v22  ;;  %v2769_v22 = vld [vmem:[%s3184_s9 + $0x10] sm:$0xff] }
 0x4c1   : > { %v1730_v30 = vpop.f32.mrf.mxu1  ;;  %v1696_v21 = vadd.f32 %v3789_v60, %v3793_v25  ;;  %v2767_v60 = vld [vmem:[%s3184_s9] sm:$0xff]  ;;  %v4031_v25 = vld [vmem:[#allocation12_spill] sm:$0xff] }
 0x4c2   : > { %v1842_v32 = vpack.c.bf16 %v1819_v8, %v1817_v5 }
 0x4c5   : > { %v1777_v20 = vpop.f32.mrf.mxu2 }
 0x4c6   : > { %v1827_v47 = vadd.f32 %v1826_v16, %v1777_v20 }
 0x4c7   : > { %v1681_v23 = vpop.f32.mrf.mxu0  ;;  %v1828_v33 = vpop.f32.mrf.mxu3 }
 0x4c8   : > { %v1731_v11 = vadd.f32 %v1730_v30, %v1681_v23 }
 0x4ca   : > { %v1845_v31 = vpack.c.bf16 %v1731_v11, %v1729_v14 }
 0x4cc   : > { %1854 = vmatpush.bf16.msra.mxu0 %v1845_v31 }
 0x4cd   : > { %v1779_v40 = vpop.f32.mrf.mxu2 }
 0x4ce   : > { %v1829_v58 = vadd.f32 %v1828_v33, %v1779_v40 }
 0x4d0   : > { %v1846_v53 = vpack.c.bf16 %v1829_v58, %v1827_v47  ;;  %1855 = vmatpush.bf16.msra.mxu0 %v1843_v46 }
 0x4d2   : > { %1903 = vmatpush.bf16.msra.mxu1 %v1846_v53  ;;  %v1831_v53 = vpack.c.bf16 %v1696_v21, %v3787_v39  ;;  %v2768_v39 = vld [vmem:[%s3184_s9 + $0x8] sm:$0xff] }
 0x4d4   : > { %1856 = vmatpush.bf16.msra.mxu0 %v1841_v18  ;;  %v1701_v18 = vadd.f32 %v3801_v41, %v3805_v63  ;;  %v4029_v41 = vpack.c.bf16 %v3819_v24, %v3815_v52  ;;  %v4030_v63 = vpack.c.bf16 %v3807_v7, %v3803_v50  ;;  %v2770_v52 = vld [vmem:[%s3184_s9 + $0x18] sm:$0xff]  ;;  %v2771_v50 = vld [vmem:[%s3184_s9 + $0x20] sm:$0xff]  ;;  %v2772_v7 = vld [vmem:[%s3184_s9 + $0x28] sm:$0xff] }
 0x4d5   : > { %v4033_v24 = vld [vmem:[#allocation13_spill] sm:$0xff] }
 0x4d6   : > { %1904 = vmatpush.bf16.msra.mxu1 %v1844_v4  ;;  %v1833_v26 = vpack.c.bf16 %v1701_v18, %v3799_v1  ;;  %v4032_v1 = vpack.c.bf16 %v3795_v6, %v4031_v25  ;;  %v2773_v6 = vld [vmem:[%s3184_s9 + $0x30] sm:$0xff]  ;;  %s3879_s9 = scalar_lea.vmem [#allocation2], %s2110_s27 }
 0x4d7   : > { %s2029_s6 = sshll.u32 %s3879_s9, 4  ;;  %s2030_s6 = int_to_ptr.vmem [resolvable:$true] %s2029_s6 }
 0x4d8   : > { %1857 = vmatpush.bf16.msra.mxu0 %v1839_v12 }
 0x4da   : > { %1905 = vmatpush.bf16.msra.mxu1 %v1842_v32 }
 0x4dc   : > { %1858 = vmatpush.bf16.msra.mxu0 %v1837_v17 }
 0x4de   : > { %1906 = vmatpush.bf16.msra.mxu1 %v1840_v48 }
 0x4e0   : > { %1859 = vmatpush.bf16.msra.mxu0 %v1835_v13 }
 0x4e2   : > { %1907 = vmatpush.bf16.msra.mxu1 %v4028_v56 }
 0x4e4   : > { %1860 = vmatpush.bf16.msra.mxu0 %v1833_v26 }
 0x4e6   : > { %1908 = vmatpush.bf16.msra.mxu1 %v4029_v41 }
 0x4e8   : > { %1861 = vmatpush.bf16.msra.mxu0 %v1831_v53 }
 0x4ea   : > { %1909 = vmatpush.bf16.msra.mxu1 %v4030_v63 }
 0x4eb   : > { %1862 = vmatmul.bf16.vlgmr.msra.gmra.mxu0 %v2767_v60 }
 0x4ee   : > { %1910 = vmatpush.bf16.msra.mxu1 %v4032_v1 }
 0x4f1   : > { %1911 = vmatmul.bf16.vlgmr.msra.gmra.mxu1 %v2767_v60 }
 0x4fb   : > { %1867 = vmatmul.bf16.gmra.mxu0 %v2768_v39 }
 0x501   : > { %1916 = vmatmul.bf16.gmra.mxu1 %v2768_v39 }
 0x50b   : > { %1872 = vmatmul.bf16.gmra.mxu0 %v2769_v22 }
 0x511   : > { %1921 = vmatmul.bf16.gmra.mxu1 %v2769_v22 }
 0x51b   : > { %1877 = vmatmul.bf16.gmra.mxu0 %v2770_v52 }
 0x521   : > { %1926 = vmatmul.bf16.gmra.mxu1 %v2770_v52 }
 0x52b   : > { %1882 = vmatmul.bf16.gmra.mxu0 %v2771_v50 }
 0x531   : > { %1931 = vmatmul.bf16.gmra.mxu1 %v2771_v50 }
 0x53b   : > { %1887 = vmatmul.bf16.gmra.mxu0 %v2772_v7 }
 0x541   : > { %1936 = vmatmul.bf16.gmra.mxu1 %v2772_v7 }
 0x54b   : > { %1892 = vmatmul.bf16.gmra.mxu0 %v2773_v6 }
 0x551   : > { %1941 = vmatmul.bf16.gmra.mxu1 %v2773_v6 }
 0x55b   : > { %1897 = vmatmul.bf16.gmra.mxu0 %v4033_v24 }
 0x561   : > { %1946 = vmatmul.bf16.gmra.mxu1 %v4033_v24 }
 0x568   : > { %v1863_v19 = vpop.f32.mrf.mxu0 }
 0x569   : > { %v1864_v44 = vadd.f32 %v1863_v19, %v3872_v36 }
 0x56b   : > { %v1952_v45 = vmax.f32 %v1864_v44, 0.0 }
 0x56d   : > { %1984 = vst [vmem:[%s3879_s9] sm:$0xff] %v1952_v45 }
 0x56e   : > { %v1912_v54 = vpop.f32.mrf.mxu1 }
 0x56f   : > { %v1913_v55 = vadd.f32 %v1912_v54, %v3877_v49 }
 0x570   : > { %v1865_v62 = vpop.f32.mrf.mxu0 }
 0x571   : > { %v1953_v2 = vmax.f32 %v1913_v55, 0.0  ;;  %v1866_v10 = vadd.f32 %v1865_v62, %v3872_v36 }
 0x573   : > { %1985 = vst [vmem:[%s3879_s9 + $0x8] sm:$0xff] %v1953_v2  ;;  %v1954_v9 = vmax.f32 %v1866_v10, 0.0 }
 0x575   : > { %1986 = vst [vmem:[%s3879_s9 + $0x10] sm:$0xff] %v1954_v9 }
 0x576   : > { %v1914_v15 = vpop.f32.mrf.mxu1 }
 0x577   : > { %v1915_v28 = vadd.f32 %v1914_v15, %v3877_v49 }
 0x578   : > { %v1868_v34 = vpop.f32.mrf.mxu0 }
 0x579   : > { %v1955_v43 = vmax.f32 %v1915_v28, 0.0  ;;  %v1869_v61 = vadd.f32 %v1868_v34, %v3872_v36 }
 0x57b   : > { %1987 = vst [vmem:[%s3879_s9 + $0x18] sm:$0xff] %v1955_v43  ;;  %v1956_v51 = vmax.f32 %v1869_v61, 0.0 }
 0x57d   : > { %1988 = vst [vmem:[%s3879_s9 + $0x20] sm:$0xff] %v1956_v51 }
 0x57e   : > { %v1917_v57 = vpop.f32.mrf.mxu1 }
 0x57f   : > { %v1918_v3 = vadd.f32 %v1917_v57, %v3877_v49 }
 0x580   : > { %v1870_v59 = vpop.f32.mrf.mxu0 }
 0x581   : > { %v1957_v16 = vmax.f32 %v1918_v3, 0.0  ;;  %v1871_v20 = vadd.f32 %v1870_v59, %v3872_v36 }
 0x583   : > { %1989 = vst [vmem:[%s3879_s9 + $0x28] sm:$0xff] %v1957_v16  ;;  %v1958_v30 = vmax.f32 %v1871_v20, 0.0 }
 0x585   : > { %1990 = vst [vmem:[%s3879_s9 + $0x30] sm:$0xff] %v1958_v30 }
 0x586   : > { %v1919_v23 = vpop.f32.mrf.mxu1 }
 0x587   : > { %v1920_v14 = vadd.f32 %v1919_v23, %v3877_v49 }
 0x588   : > { %v1873_v11 = vpop.f32.mrf.mxu0 }
 0x589   : > { %v1959_v29 = vmax.f32 %v1920_v14, 0.0  ;;  %v1874_v31 = vadd.f32 %v1873_v11, %v3872_v36 }
 0x58b   : > { %1991 = vst [vmem:[%s3879_s9 + $0x38] sm:$0xff] %v1959_v29  ;;  %v1960_v35 = vmax.f32 %v1874_v31, 0.0 }
 0x58d   : > { %1992 = vst [vmem:[%s3879_s9 + $0x40] sm:$0xff] %v1960_v35 }
 0x58e   : > { %v1922_v33 = vpop.f32.mrf.mxu1 }
 0x58f   : > { %v1923_v40 = vadd.f32 %v1922_v33, %v3877_v49 }
 0x590   : > { %v1875_v42 = vpop.f32.mrf.mxu0 }
 0x591   : > { %v1961_v46 = vmax.f32 %v1923_v40, 0.0  ;;  %v1876_v47 = vadd.f32 %v1875_v42, %v3872_v36 }
 0x593   : > { %1993 = vst [vmem:[%s3879_s9 + $0x48] sm:$0xff] %v1961_v46  ;;  %v1962_v58 = vmax.f32 %v1876_v47, 0.0 }
 0x595   : > { %1994 = vst [vmem:[%s3879_s9 + $0x50] sm:$0xff] %v1962_v58 }
 0x596   : > { %v1924_v8 = vpop.f32.mrf.mxu1 }
 0x597   : > { %v1925_v4 = vadd.f32 %v1924_v8, %v3877_v49 }
 0x598   : > { %v1878_v37 = vpop.f32.mrf.mxu0 }
 0x599   : > { %v1963_v12 = vmax.f32 %v1925_v4, 0.0  ;;  %v1879_v5 = vadd.f32 %v1878_v37, %v3872_v36 }
 0x59b   : > { %1995 = vst [vmem:[%s3879_s9 + $0x58] sm:$0xff] %v1963_v12  ;;  %v1964_v27 = vmax.f32 %v1879_v5, 0.0 }
 0x59d   : > { %1996 = vst [vmem:[%s3879_s9 + $0x60] sm:$0xff] %v1964_v27 }
 0x59e   : > { %v1927_v32 = vpop.f32.mrf.mxu1 }
 0x59f   : > { %v1928_v0 = vadd.f32 %v1927_v32, %v3877_v49 }
 0x5a0   : > { %v1880_v17 = vpop.f32.mrf.mxu0 }
 0x5a1   : > { %v1965_v48 = vmax.f32 %v1928_v0, 0.0  ;;  %v1881_v18 = vadd.f32 %v1880_v17, %v3872_v36 }
 0x5a3   : > { %1997 = vst [vmem:[%s3879_s9 + $0x68] sm:$0xff] %v1965_v48  ;;  %v1966_v13 = vmax.f32 %v1881_v18, 0.0 }
 0x5a5   : > { %1998 = vst [vmem:[%s3879_s9 + $0x70] sm:$0xff] %v1966_v13 }
 0x5a6   : > { %v1929_v21 = vpop.f32.mrf.mxu1 }
 0x5a7   : > { %v1930_v26 = vadd.f32 %v1929_v21, %v3877_v49 }
 0x5a8   : > { %v1883_v56 = vpop.f32.mrf.mxu0 }
 0x5a9   : > { %v1967_v53 = vmax.f32 %v1930_v26, 0.0  ;;  %v1884_v41 = vadd.f32 %v1883_v56, %v3872_v36 }
 0x5ab   : > { %1999 = vst [vmem:[%s3879_s9 + $0x78] sm:$0xff] %v1967_v53  ;;  %v1968_v63 = vmax.f32 %v1884_v41, 0.0 }
 0x5ad   : > { %2000 = vst [vmem:[%s3879_s9 + $0x80] sm:$0xff] %v1968_v63 }
 0x5ae   : > { %v1932_v60 = vpop.f32.mrf.mxu1 }
 0x5af   : > { %v1933_v25 = vadd.f32 %v1932_v60, %v3877_v49 }
 0x5b0   : > { %v1885_v1 = vpop.f32.mrf.mxu0 }
 0x5b1   : > { %v1969_v39 = vmax.f32 %v1933_v25, 0.0  ;;  %v1886_v22 = vadd.f32 %v1885_v1, %v3872_v36 }
 0x5b3   : > { %2001 = vst [vmem:[%s3879_s9 + $0x88] sm:$0xff] %v1969_v39  ;;  %v1970_v52 = vmax.f32 %v1886_v22, 0.0 }
 0x5b5   : > { %2002 = vst [vmem:[%s3879_s9 + $0x90] sm:$0xff] %v1970_v52 }
 0x5b6   : > { %v1934_v50 = vpop.f32.mrf.mxu1 }
 0x5b7   : > { %v1935_v7 = vadd.f32 %v1934_v50, %v3877_v49 }
 0x5b8   : > { %v1888_v6 = vpop.f32.mrf.mxu0 }
 0x5b9   : > { %v1971_v24 = vmax.f32 %v1935_v7, 0.0  ;;  %v1889_v38 = vadd.f32 %v1888_v6, %v3872_v36 }
 0x5bb   : > { %2003 = vst [vmem:[%s3879_s9 + $0x98] sm:$0xff] %v1971_v24  ;;  %v1972_v19 = vmax.f32 %v1889_v38, 0.0 }
 0x5bd   : > { %2004 = vst [vmem:[%s3879_s9 + $0xa0] sm:$0xff] %v1972_v19 }
 0x5be   : > { %v1937_v44 = vpop.f32.mrf.mxu1 }
 0x5bf   : > { %v1938_v45 = vadd.f32 %v1937_v44, %v3877_v49 }
 0x5c0   : > { %v1890_v54 = vpop.f32.mrf.mxu0 }
 0x5c1   : > { %v1973_v55 = vmax.f32 %v1938_v45, 0.0  ;;  %v1891_v62 = vadd.f32 %v1890_v54, %v3872_v36 }
 0x5c3   : > { %2005 = vst [vmem:[%s3879_s9 + $0xa8] sm:$0xff] %v1973_v55  ;;  %v1974_v2 = vmax.f32 %v1891_v62, 0.0 }
 0x5c5   : > { %2006 = vst [vmem:[%s3879_s9 + $0xb0] sm:$0xff] %v1974_v2 }
 0x5c6   : > { %v1939_v10 = vpop.f32.mrf.mxu1 }
 0x5c7   : > { %v1940_v9 = vadd.f32 %v1939_v10, %v3877_v49 }
 0x5c8   : > { %v1893_v15 = vpop.f32.mrf.mxu0 }
 0x5c9   : > { %v1975_v28 = vmax.f32 %v1940_v9, 0.0  ;;  %v1894_v34 = vadd.f32 %v1893_v15, %v3872_v36 }
 0x5cb   : > { %2007 = vst [vmem:[%s3879_s9 + $0xb8] sm:$0xff] %v1975_v28  ;;  %v1976_v43 = vmax.f32 %v1894_v34, 0.0 }
 0x5cd   : > { %2008 = vst [vmem:[%s3879_s9 + $0xc0] sm:$0xff] %v1976_v43 }
 0x5ce   : > { %v1942_v61 = vpop.f32.mrf.mxu1 }
 0x5cf   : > { %v1943_v51 = vadd.f32 %v1942_v61, %v3877_v49 }
 0x5d0   : > { %v1895_v57 = vpop.f32.mrf.mxu0 }
 0x5d1   : > { %v1977_v3 = vmax.f32 %v1943_v51, 0.0  ;;  %v1896_v59 = vadd.f32 %v1895_v57, %v3872_v36 }
 0x5d3   : > { %2009 = vst [vmem:[%s3879_s9 + $0xc8] sm:$0xff] %v1977_v3  ;;  %v1978_v16 = vmax.f32 %v1896_v59, 0.0 }
 0x5d5   : > { %2010 = vst [vmem:[%s3879_s9 + $0xd0] sm:$0xff] %v1978_v16 }
 0x5d6   : > { %v1944_v20 = vpop.f32.mrf.mxu1 }
 0x5d7   : > { %v1945_v30 = vadd.f32 %v1944_v20, %v3877_v49 }
 0x5d8   : > { %v1898_v23 = vpop.f32.mrf.mxu0 }
 0x5d9   : > { %v1979_v14 = vmax.f32 %v1945_v30, 0.0  ;;  %v1899_v11 = vadd.f32 %v1898_v23, %v3872_v36 }
 0x5db   : > { %2011 = vst [vmem:[%s3879_s9 + $0xd8] sm:$0xff] %v1979_v14  ;;  %v1980_v29 = vmax.f32 %v1899_v11, 0.0 }
 0x5dd   : > { %2012 = vst [vmem:[%s3879_s9 + $0xe0] sm:$0xff] %v1980_v29 }
 0x5de   : > { %v1947_v31 = vpop.f32.mrf.mxu1 }
 0x5df   : > { %v1948_v35 = vadd.f32 %v1947_v31, %v3877_v49 }
 0x5e0   : > { %v1900_v33 = vpop.f32.mrf.mxu0 }
 0x5e1   : > { %v1981_v40 = vmax.f32 %v1948_v35, 0.0  ;;  %v1901_v42 = vadd.f32 %v1900_v33, %v3872_v36 }
 0x5e3   : > { %2013 = vst [vmem:[%s3879_s9 + $0xe8] sm:$0xff] %v1981_v40  ;;  %v1982_v46 = vmax.f32 %v1901_v42, 0.0 }
 0x5e5   : > { %2014 = vst [vmem:[%s3879_s9 + $0xf0] sm:$0xff] %v1982_v46 }
 0x5e6   : > { %v1949_v47 = vpop.f32.mrf.mxu1 }
 0x5e7   : > { %v1950_v58 = vadd.f32 %v1949_v47, %v3877_v49 }
 0x5e9   : > { %v1983_v8 = vmax.f32 %v1950_v58, 0.0 }
 0x5eb   : > { %2015 = vst [vmem:[%s3879_s9 + $0xf8] sm:$0xff] %v1983_v8 }
 0x5ec   : > { %2801 = shalt.err (!%p2798_p3)
}
 0x5ed   : > { %s2838_s22 = smov 256   ;;  %s2839_s23 = smov 16  }
 0x5ee   : > { %2725 = dma.vmem_to_hbm [thread:$0]  (%p2903_p5), %s2030_s6, 4096, %s2032_s14, %s2017_s19, %s2838_s22, %s2838_s22, %s2839_s23  }
 0x5ef PF: > { %p2731_p4 = scmp.ge.s32.totalorder %s2836_s18, 2  ;;  %s2046_s27 = sand.u32 1, %s2824_s15  }
 0x5f0   : > { %s2047_s9 = scalar_lea.sflag [#allocation3], %s2046_s27 }
 0x5f1   : > { %p2728_p7 = pnand %p2731_p4, %p2907_p6 }
 0x5f3   : > { %p2729_p8 = pneg %p2728_p7 }
 0x5f5   : > { %2819 = dma.done.wait (%p2729_p8), %s2047_s9, 4096  }
 0x5f6   : > { %2821 = vsyncadd (%p2729_p8), %s2047_s9, 4294963200  ;;  %p14_p9 = scmp.ge.s32.totalorder %s2890_s21, 4   ;;  %s4034_s15 = smov %s2828_s16 }
 0x5f7   : > { %s4035_s16 = smov %s2832_s17  ;;  %s4036_s17 = smov %s2901_s24 }
 0x5f8   : > { %s4037_s18 = smov %s2890_s21  ;;  %16 = sbr.rel (!%p14_p9) target bundleno = 3 (0x3), region = 78 }
 0x5fd   :  { %2053 = vsyncpa [#allocation3], 1 }
 0x5fe   :  { %2055 = vsyncpa [#allocation3 + $0x1], 1 }

</bundles_post_ra>
